<compile_context>
chip_gen: v5e
topology: v5e:2x2
jax: 0.10.0
libtpu: 0.0.40
codegen_flags: <defaults>
</compile_context>

<pallas_src>
import math
import functools

import jax
import jax.numpy as jnp
from jax import lax
from jax.experimental import pallas as pl
from jax.experimental.pallas import tpu as pltpu

# ----------------------------- config (consistent with SGTN.__init__) -----------------
INPUT_CHANNELS = 3          # args.input_channels
PREDS, PREDS_STEP = 8, 2
N_CLASSES = int(PREDS / PREDS_STEP)          # 4
D_MODEL = 32                # args.transformer_dim
N_HEAD = 4                  # args.transformer_heads
N_ENC_LAYERS = 1            # args.transformer_layers (baked into the fused kernel)
FF_DIM = 64                 # args.transformer_ff_dim
GRAPH_HIDDEN = 32           # args.graph_hidden
GAT_HEADS = 2               # args.gat_heads
ALPHA = 0.2                 # args.alpha
GNN_LAYERS = 2              # args.gnn_layers (baked into the fused kernel)
NUM_CONTEXT_INPUT_C = 2     # args.num_context_input_c
CNN_KERNELS = 2             # args.cnn_kernels (so conv output length == obs-1)
OBS = 8                     # args.obs (sequence length)
NUM_CONTEXT_OUTPUT_C = 8    # args.num_context_output_c
MLP_LAYER = 32              # args.mlp_layer
NUM_AGENTS = 2
LN_EPS = 1e-5
NEG_INF = -1e30


# ----------------------------- the single fused Pallas kernel -------------------------
def _sgtn_fused_kernel(
    traj_ref, pe_ref, ctx_ref, adj_ref, mask_ref, pool_ref,
    emb_w_ref, w_in_ref, w1_ref, w2_ref,
    gat_w_ref, gat_wad_ref, ctx_w_ref,
    wh1s_ref, wh1c_ref, wh2_ref, bias_ref,
    out_ref,
    *, A, S, D, nhead, gat_heads, ghidden, alpha,
):
    f32 = jnp.float32
    AS = A * S
    Dh = D // nhead
    HD = nhead * D          # width of the fused V@Wo block in w_in

    bias = bias_ref[...]    # (16, 128) packed row-vector params

    def row(i, n):
        return bias[i:i + 1, :n]

    def layernorm(x, g, b):
        mu = jnp.mean(x, axis=-1, keepdims=True)
        var = jnp.mean(jnp.square(x - mu), axis=-1, keepdims=True)
        return (x - mu) * lax.rsqrt(var + LN_EPS) * g + b

    def softmax_lastdim(s):
        s = s - jnp.max(s, axis=-1, keepdims=True)
        p = jnp.exp(s)
        # divide lands on the EUP slot instead of a VPU divide
        return p * pl.reciprocal(jnp.sum(p, axis=-1, keepdims=True), approx=True)

    # ---------------- embedding + positional encoding (emb bias pre-added into pe) ----
    x2 = jnp.dot(traj_ref[...], emb_w_ref[...], preferred_element_type=f32) + pe_ref[...]

    # ---------------- transformer encoder layer (post-norm, relu, eval) ---------------
    # One lane-dense projection: [V@Wo (per head) | Wq*scale | Wk]  -> (AS, H*D + 2D)
    proj = jnp.dot(x2, w_in_ref[...], preferred_element_type=f32)
    qk = proj[:, HD:HD + 2 * D] + row(0, 2 * D)            # q (scaled) | k
    mask_bias = mask_ref[...]                              # additive block-diag mask

    attn = None
    for h in range(nhead):                                 # static unroll
        qh = qk[:, h * Dh:(h + 1) * Dh]
        kh = qk[:, D + h * Dh:D + (h + 1) * Dh]
        s = lax.dot_general(qh, kh, (((1,), (1,)), ((), ())),
                            preferred_element_type=f32)    # (AS, AS), scale pre-folded
        p = softmax_lastdim(s + mask_bias)
        voh = proj[:, h * D:(h + 1) * D]                   # V_h @ Wo_h  (AS, D)
        o = jnp.dot(p, voh, preferred_element_type=f32)
        attn = o if attn is None else attn + o
    attn = attn + row(1, D)                                # bv@Wo + bo

    h1 = layernorm(x2 + attn, row(2, D), row(3, D))
    ff = jnp.maximum(jnp.dot(h1, w1_ref[...], preferred_element_type=f32)
                     + row(4, FF_DIM), 0.0)
    ff = jnp.dot(ff, w2_ref[...], preferred_element_type=f32) + row(5, D)
    h2 = layernorm(h1 + ff, row(6, D), row(7, D))          # (AS, D)

    # ---------------- mean-pool over the sequence (precomputed pool matrix) -----------
    temporal = jnp.dot(pool_ref[...], h2, preferred_element_type=f32)   # (A, D)

    # ---------------- GAT stack -------------------------------------------------------
    # TODO(synk): GraphAttentionLayer source not provided; standard multi-head GAT
    # (LeakyReLU attention, adjacency-masked softmax, head averaging, ELU) assumed.
    adj = adj_ref[...]
    HG = gat_heads * ghidden

    def gat_layer(hin, w_stk, wad):
        # w_stk: (Fin, H*G + H) = [W_0 .. W_{H-1} | W_0 a_src_0 .. W_{H-1} a_src_{H-1}]
        wh_all = jnp.dot(hin, w_stk, preferred_element_type=f32)        # (A, H*G + H)
        # dst side: one (H,Fin)x(A,Fin)->(H,A) dot per layer (instead of per head)
        dst_rows = lax.dot_general(wad, hin, (((1,), (1,)), ((), ())),
                                   preferred_element_type=f32)          # (H, A)
        acc = None
        for hd in range(gat_heads):
            wh = wh_all[:, hd * ghidden:(hd + 1) * ghidden]             # (A, G)
            e = wh_all[:, HG + hd:HG + hd + 1] + dst_rows[hd:hd + 1, :]  # (A, A)
            e = jnp.where(e > 0, e, alpha * e)                          # LeakyReLU
            e = jnp.where(adj > 0, e, -9e15)
            p = softmax_lastdim(e)
            oh = jnp.dot(p, wh, preferred_element_type=f32)             # (A, G)
            acc = oh if acc is None else acc + oh
        out = acc * (1.0 / gat_heads)
        return jnp.where(out > 0, out, jnp.exp(out) - 1.0)              # ELU

    spatial = gat_layer(temporal, gat_w_ref[0], gat_wad_ref[0])
    spatial = gat_layer(spatial, gat_w_ref[1], gat_wad_ref[1])          # (A, G)

    # ---------------- context: Conv1d+Linear folded into one matmul, then ReLU --------
    ctx_feat = jnp.maximum(
        jnp.dot(ctx_ref[...], ctx_w_ref[...], preferred_element_type=f32)
        + row(8, NUM_CONTEXT_OUTPUT_C), 0.0)                            # (A, Nctx)

    # ---------------- fused prediction + uncertainty heads (no concatenate) -----------
    h12 = jnp.maximum(
        jnp.dot(spatial, wh1s_ref[...], preferred_element_type=f32)
        + jnp.dot(ctx_feat, wh1c_ref[...], preferred_element_type=f32)
        + row(9, 2 * MLP_LAYER), 0.0)                                   # (A, 2*MLP)
    # wh2 is block-diagonal, zero-padded to 128 lanes -> lane-dense output store
    out_ref[...] = (jnp.dot(h12, wh2_ref[...], preferred_element_type=f32)
                    + bias[10:11, :])                                   # (A, 128)


# ----------------------------- model glue ---------------------------------------------
def positional_encoding(seq_len, d_model):
    position = jnp.arange(seq_len, dtype=jnp.float32)[:, None]
    div_term = jnp.exp(jnp.arange(0, d_model, 2, dtype=jnp.float32)
                       * (-math.log(10000.0) / d_model))
    pe = jnp.zeros((seq_len, d_model), jnp.float32)
    pe = pe.at[:, 0::2].set(jnp.sin(position * div_term))
    pe = pe.at[:, 1::2].set(jnp.cos(position * div_term))
    return pe


def sgtn_forward_batched(fp, xs, adjs, ctxs):
    """Batched forward: xs (B,S,Cin,A), adjs (B,A,A), ctxs (B,S,Cctx,A).
    Grid over the batch so multiple scenes amortize launch/DMA overhead and shard
    across v7x's two TensorCores (dimension_semantics=("parallel",))."""
    B, S, Cin, A = xs.shape
    assert S == OBS and Cin == INPUT_CHANNELS
    assert fp["pool"].shape[0] == A, "fused params were built for a different num_agents"

    traj = jnp.transpose(xs, (0, 3, 1, 2)).reshape(B, A * S, Cin).astype(jnp.float32)
    ctx = jnp.transpose(ctxs, (0, 3, 2, 1)).reshape(B, A, -1).astype(jnp.float32)
    adjs = adjs.astype(jnp.float32)

    kern = functools.partial(
        _sgtn_fused_kernel, A=A, S=S, D=D_MODEL, nhead=N_HEAD,
        gat_heads=GAT_HEADS, ghidden=GRAPH_HIDDEN, alpha=ALPHA)

    def const_spec(arr):
        nd = arr.ndim
        return pl.BlockSpec(tuple(arr.shape), lambda b, _n=nd: (0,) * _n)

    def batch_spec(arr):
        nd = arr.ndim - 1
        return pl.BlockSpec((None,) + tuple(arr.shape[1:]),
                            lambda b, _n=nd: (b,) + (0,) * _n)

    args = [traj, fp["pe_bias"], ctx, adjs, fp["mask_bias"], fp["pool"],
            fp["emb_w"], fp["w_in"], fp["w1"], fp["w2"],
            fp["gat_w"], fp["gat_wad"], fp["ctx_w"],
            fp["wh1_sp"], fp["wh1_ctx"], fp["wh2"], fp["bias_blob"]]
    in_specs = [batch_spec(traj), const_spec(fp["pe_bias"]), batch_spec(ctx),
                batch_spec(adjs), const_spec(fp["mask_bias"]), const_spec(fp["pool"]),
                const_spec(fp["emb_w"]), const_spec(fp["w_in"]), const_spec(fp["w1"]),
                const_spec(fp["w2"]), const_spec(fp["gat_w"]), const_spec(fp["gat_wad"]),
                const_spec(fp["ctx_w"]), const_spec(fp["wh1_sp"]),
                const_spec(fp["wh1_ctx"]), const_spec(fp["wh2"]),
                const_spec(fp["bias_blob"])]

    out = pl.pallas_call(
        kern,
        grid=(B,),
        in_specs=in_specs,
        out_specs=pl.BlockSpec((None, A, 128), lambda b: (b, 0, 0)),
        out_shape=jax.ShapeDtypeStruct((B, A, 128), jnp.float32),
        compiler_params=pltpu.CompilerParams(dimension_semantics=("parallel",)),
    )(*args)

    n_pred = N_CLASSES * INPUT_CHANNELS
    pred = out[..., :n_pred].reshape(B, A, N_CLASSES, INPUT_CHANNELS)
    unc = out[..., n_pred:3 * n_pred].reshape(B, A, N_CLASSES, 2 * INPUT_CHANNELS)
    means = unc[..., :INPUT_CHANNELS]
    log_vars = unc[..., INPUT_CHANNELS:]
    return pred, means, log_vars


def sgtn_forward(fp, x, adj, context):
    """Single-scene forward matching SGTN.forward(x, y, adj, context) (y unused)."""
    pred, means, log_vars = sgtn_forward_batched(fp, x[None], adj[None], context[None])
    return pred[0], means[0], log_vars[0]


# ----------------------------- deterministic parameter init ---------------------------
def _xavier(key, shape, fan_in, fan_out):
    bound = math.sqrt(6.0 / (fan_in + fan_out))
    return jax.random.uniform(key, shape, jnp.float32, -bound, bound)


def init_params(key):
    keys = iter(jax.random.split(key, 64))
    p = {}
    p["emb_w"] = _xavier(next(keys), (INPUT_CHANNELS, D_MODEL), INPUT_CHANNELS, D_MODEL)
    p["emb_b"] = jnp.zeros((D_MODEL,), jnp.float32)

    enc_layers = []
    for _ in range(N_ENC_LAYERS):
        lp = {}
        for nm in ("wq", "wk", "wv", "wo"):
            lp[nm] = _xavier(next(keys), (D_MODEL, D_MODEL), D_MODEL, D_MODEL)
        for nm in ("bq", "bk", "bv", "bo"):
            lp[nm] = jnp.zeros((D_MODEL,), jnp.float32)
        lp["w1"] = _xavier(next(keys), (D_MODEL, FF_DIM), D_MODEL, FF_DIM)
        lp["b1"] = jnp.zeros((FF_DIM,), jnp.float32)
        lp["w2"] = _xavier(next(keys), (FF_DIM, D_MODEL), FF_DIM, D_MODEL)
        lp["b2"] = jnp.zeros((D_MODEL,), jnp.float32)
        lp["ln1_g"] = jnp.ones((D_MODEL,), jnp.float32)
        lp["ln1_b"] = jnp.zeros((D_MODEL,), jnp.float32)
        lp["ln2_g"] = jnp.ones((D_MODEL,), jnp.float32)
        lp["ln2_b"] = jnp.zeros((D_MODEL,), jnp.float32)
        enc_layers.append(lp)
    p["enc_layers"] = enc_layers

    gat_layers = []
    for i in range(GNN_LAYERS):
        fin = D_MODEL if i == 0 else GRAPH_HIDDEN
        gat_layers.append({
            "W": _xavier(next(keys), (GAT_HEADS, fin, GRAPH_HIDDEN), fin, GRAPH_HIDDEN),
            "a_src": _xavier(next(keys), (GAT_HEADS, GRAPH_HIDDEN), 2 * GRAPH_HIDDEN, 1),
            "a_dst": _xavier(next(keys), (GAT_HEADS, GRAPH_HIDDEN), 2 * GRAPH_HIDDEN, 1),
        })
    p["gat_layers"] = gat_layers

    p["conv_w"] = _xavier(next(keys), (NUM_CONTEXT_INPUT_C, CNN_KERNELS),
                          NUM_CONTEXT_INPUT_C * CNN_KERNELS, 1)
    p["conv_b"] = jnp.zeros((1,), jnp.float32)
    p["ctx_lin_w"] = _xavier(next(keys), (OBS - 1, NUM_CONTEXT_OUTPUT_C),
                             OBS - 1, NUM_CONTEXT_OUTPUT_C)
    p["ctx_lin_b"] = jnp.zeros((NUM_CONTEXT_OUTPUT_C,), jnp.float32)

    comb = GRAPH_HIDDEN + NUM_CONTEXT_OUTPUT_C
    p["tp1_w"] = _xavier(next(keys), (comb, MLP_LAYER), comb, MLP_LAYER)
    p["tp1_b"] = jnp.zeros((MLP_LAYER,), jnp.float32)
    p["tp2_w"] = _xavier(next(keys), (MLP_LAYER, N_CLASSES * INPUT_CHANNELS),
                         MLP_LAYER, N_CLASSES * INPUT_CHANNELS)
    p["tp2_b"] = jnp.zeros((N_CLASSES * INPUT_CHANNELS,), jnp.float32)
    p["ue1_w"] = _xavier(next(keys), (comb, MLP_LAYER), comb, MLP_LAYER)
    p["ue1_b"] = jnp.zeros((MLP_LAYER,), jnp.float32)
    p["ue2_w"] = _xavier(next(keys), (MLP_LAYER, N_CLASSES * INPUT_CHANNELS * 2),
                         MLP_LAYER, N_CLASSES * INPUT_CHANNELS * 2)
    p["ue2_b"] = jnp.zeros((N_CLASSES * INPUT_CHANNELS * 2,), jnp.float32)
    return p


def prepare_fused_params(p, num_agents=NUM_AGENTS, obs=OBS):
    """One-time (eager) parameter fusion.  Pure reparameterization — semantics unchanged."""
    assert len(p["enc_layers"]) == 1 and len(p["gat_layers"]) == 2
    assert D_MODEL == GRAPH_HIDDEN  # GAT weight stacking assumes equal fan-in
    A, S, D = num_agents, obs, D_MODEL
    Dh = D // N_HEAD
    f32 = jnp.float32
    fp = {}

    # embedding weight; emb bias pre-added into the tiled positional encoding
    fp["emb_w"] = p["emb_w"]
    pe = positional_encoding(S, D)
    fp["pe_bias"] = (jnp.tile(pe, (A, 1)) + p["emb_b"][None, :]).astype(f32)

    # host-precomputed block-diagonal attention mask (additive) and mean-pool matrix
    agent_ids = jnp.arange(A * S, dtype=jnp.int32) // S
    fp["mask_bias"] = jnp.where(agent_ids[:, None] == agent_ids[None, :],
                                0.0, NEG_INF).astype(f32)
    fp["pool"] = jnp.where(jnp.arange(A, dtype=jnp.int32)[:, None] == agent_ids[None, :],
                           1.0 / S, 0.0).astype(f32)

    # transformer: fused [Wv@Wo (per head) | Wq*scale | Wk] projection (D, H*D + 2D)
    lp = p["enc_layers"][0]
    scale = 1.0 / math.sqrt(Dh)
    wvo = jnp.concatenate(
        [lp["wv"][:, h * Dh:(h + 1) * Dh] @ lp["wo"][h * Dh:(h + 1) * Dh, :]
         for h in range(N_HEAD)], axis=1)
    fp["w_in"] = jnp.concatenate([wvo, lp["wq"] * scale, lp["wk"]], axis=1)
    bqk = jnp.concatenate([lp["bq"] * scale, lp["bk"]])
    bvo = (lp["bv"][None, :] @ lp["wo"])[0] + lp["bo"]
    fp["w1"], fp["w2"] = lp["w1"], lp["w2"]

    # GAT: stack heads + per-head src-attention columns; dst projections (H, Fin)
    g_stk, g_wad = [], []
    for gp in p["gat_layers"]:
        W = gp["W"]                                                     # (H, Fin, G)
        blocks = [W[h] for h in range(GAT_HEADS)]
        src_cols = [W[h] @ gp["a_src"][h][:, None] for h in range(GAT_HEADS)]
        g_stk.append(jnp.concatenate(blocks + src_cols, axis=1))        # (Fin, H*G + H)
        g_wad.append(jnp.stack([W[h] @ gp["a_dst"][h] for h in range(GAT_HEADS)]))
    fp["gat_w"] = jnp.stack(g_stk)                                      # (2, Fin, H*G+H)
    fp["gat_wad"] = jnp.stack(g_wad)                                    # (2, H, Fin)

    # context: Conv1d(C->1,k) folded into the following Linear (no activation between)
    L, C = S, NUM_CONTEXT_INPUT_C
    convmat = jnp.zeros((C * L, L - 1), f32)
    for c in range(C):
        for kk in range(CNN_KERNELS):
            rows = c * L + jnp.arange(L - 1) + kk
            cols = jnp.arange(L - 1)
            convmat = convmat.at[rows, cols].add(p["conv_w"][c, kk])
    fp["ctx_w"] = convmat @ p["ctx_lin_w"]                              # (C*L, Nctx)
    ctx_b = p["conv_b"][0] * jnp.sum(p["ctx_lin_w"], axis=0) + p["ctx_lin_b"]

    # fused heads: split layer-1 (no concat in kernel), block-diag lane-padded layer-2
    n_pred = N_CLASSES * INPUT_CHANNELS
    n_out = 3 * n_pred
    wh1 = jnp.concatenate([p["tp1_w"], p["ue1_w"]], axis=1)             # (G+Nctx, 2*MLP)
    fp["wh1_sp"] = wh1[:GRAPH_HIDDEN]
    fp["wh1_ctx"] = wh1[GRAPH_HIDDEN:]
    bh1 = jnp.concatenate([p["tp1_b"], p["ue1_b"]])
    wh2 = jnp.zeros((2 * MLP_LAYER, 128), f32)
    wh2 = wh2.at[:MLP_LAYER, :n_pred].set(p["tp2_w"])
    wh2 = wh2.at[MLP_LAYER:, n_pred:n_out].set(p["ue2_w"])
    fp["wh2"] = wh2
    bh2 = jnp.zeros((128,), f32).at[:n_pred].set(p["tp2_b"]).at[n_pred:n_out].set(p["ue2_b"])

    # all small row-vector params packed into one lane-padded (16, 128) blob
    def pad128(v):
        return jnp.pad(v.astype(f32), (0, 128 - v.shape[0]))
    rows_ = [bqk, bvo, lp["ln1_g"], lp["ln1_b"], lp["b1"], lp["b2"],
             lp["ln2_g"], lp["ln2_b"], ctx_b, bh1, bh2]
    blob = jnp.stack([pad128(r) for r in rows_])                        # (11, 128)
    fp["bias_blob"] = jnp.pad(blob, ((0, 16 - blob.shape[0]), (0, 0)))
    return fp


# ----------------------------- main ----------------------------------------------------
if __name__ == "__main__":
    key = jax.random.PRNGKey(0)
    kx, kc, kp, kb1, kb2 = jax.random.split(key, 5)

    x = jax.random.normal(kx, (OBS, INPUT_CHANNELS, NUM_AGENTS), jnp.float32)
    context = jax.random.normal(kc, (OBS, NUM_CONTEXT_INPUT_C, NUM_AGENTS), jnp.float32)
    adj = jnp.ones((NUM_AGENTS, NUM_AGENTS), jnp.float32)
    # y is accepted but unused by SGTN.forward; omitted here.

    params = init_params(kp)
    fused_params = prepare_fused_params(params)   # one-time fusion, outside jit

    # single scene (matches the PyTorch forward interface)
    fwd = jax.jit(sgtn_forward)
    pred, means, log_vars = fwd(fused_params, x, adj, context)
    jax.block_until_ready((pred, means, log_vars))

    assert pred.shape == (NUM_AGENTS, N_CLASSES, INPUT_CHANNELS)
    assert means.shape == (NUM_AGENTS, N_CLASSES, INPUT_CHANNELS)
    assert log_vars.shape == (NUM_AGENTS, N_CLASSES, INPUT_CHANNELS)
    assert bool(jnp.all(jnp.isfinite(pred))) and bool(jnp.all(jnp.isfinite(means)))
    assert bool(jnp.all(jnp.isfinite(log_vars)))

    # batched scenes (the single biggest real-world win: amortize launch/DMA, and
    # the parallel grid axis shards across v7x's two TensorCores)
    B = 4
    xs = jax.random.normal(kb1, (B, OBS, INPUT_CHANNELS, NUM_AGENTS), jnp.float32)
    ctxs = jax.random.normal(kb2, (B, OBS, NUM_CONTEXT_INPUT_C, NUM_AGENTS), jnp.float32)
    adjs = jnp.ones((B, NUM_AGENTS, NUM_AGENTS), jnp.float32)
    bfwd = jax.jit(sgtn_forward_batched)
    bpred, bmeans, blog_vars = bfwd(fused_params, xs, adjs, ctxs)
    jax.block_until_ready((bpred, bmeans, blog_vars))
    assert bpred.shape == (B, NUM_AGENTS, N_CLASSES, INPUT_CHANNELS)
    assert bool(jnp.all(jnp.isfinite(bpred)))

    print("KERNEL_OK")
</pallas_src>

<mosaic_0001>
module attributes {stable_mosaic.version = 11 : i64} {
  func.func @_sgtn_fused_kernel(%arg0: i32, %arg1: memref<1x16x3xf32, #tpu.memory_space<vmem>>, %arg2: memref<16x32xf32, #tpu.memory_space<vmem>>, %arg3: memref<1x2x16xf32, #tpu.memory_space<vmem>>, %arg4: memref<1x2x2xf32, #tpu.memory_space<vmem>>, %arg5: memref<16x16xf32, #tpu.memory_space<vmem>>, %arg6: memref<2x16xf32, #tpu.memory_space<vmem>>, %arg7: memref<3x32xf32, #tpu.memory_space<vmem>>, %arg8: memref<32x192xf32, #tpu.memory_space<vmem>>, %arg9: memref<32x64xf32, #tpu.memory_space<vmem>>, %arg10: memref<64x32xf32, #tpu.memory_space<vmem>>, %arg11: memref<2x32x66xf32, #tpu.memory_space<vmem>>, %arg12: memref<2x2x32xf32, #tpu.memory_space<vmem>>, %arg13: memref<16x8xf32, #tpu.memory_space<vmem>>, %arg14: memref<32x64xf32, #tpu.memory_space<vmem>>, %arg15: memref<8x64xf32, #tpu.memory_space<vmem>>, %arg16: memref<64x128xf32, #tpu.memory_space<vmem>>, %arg17: memref<16x128xf32, #tpu.memory_space<vmem>>, %arg18: memref<1x2x128xf32, #tpu.memory_space<vmem>>) attributes {dimension_semantics = [#tpu.dimension_semantics<parallel>], iteration_bounds = array<i64: 1>, scalar_prefetch = 0 : i64, scratch_operands = 0 : i64, tpu.core_type = #tpu.core_type<tc>, window_params = [{transform_indices = @transform_0, window_bounds = array<i64: 1, 16, 3>}, {pipeline_mode = #tpu.pipeline_mode<synchronous>, transform_indices = @transform_1, window_bounds = array<i64: 16, 32>}, {transform_indices = @transform_2, window_bounds = array<i64: 1, 2, 16>}, {transform_indices = @transform_3, window_bounds = array<i64: 1, 2, 2>}, {pipeline_mode = #tpu.pipeline_mode<synchronous>, transform_indices = @transform_4, window_bounds = array<i64: 16, 16>}, {pipeline_mode = #tpu.pipeline_mode<synchronous>, transform_indices = @transform_5, window_bounds = array<i64: 2, 16>}, {pipeline_mode = #tpu.pipeline_mode<synchronous>, transform_indices = @transform_6, window_bounds = array<i64: 3, 32>}, {pipeline_mode = #tpu.pipeline_mode<synchronous>, transform_indices = @transform_7, window_bounds = array<i64: 32, 192>}, {pipeline_mode = #tpu.pipeline_mode<synchronous>, transform_indices = @transform_8, window_bounds = array<i64: 32, 64>}, {pipeline_mode = #tpu.pipeline_mode<synchronous>, transform_indices = @transform_9, window_bounds = array<i64: 64, 32>}, {pipeline_mode = #tpu.pipeline_mode<synchronous>, transform_indices = @transform_10, window_bounds = array<i64: 2, 32, 66>}, {pipeline_mode = #tpu.pipeline_mode<synchronous>, transform_indices = @transform_11, window_bounds = array<i64: 2, 2, 32>}, {pipeline_mode = #tpu.pipeline_mode<synchronous>, transform_indices = @transform_12, window_bounds = array<i64: 16, 8>}, {pipeline_mode = #tpu.pipeline_mode<synchronous>, transform_indices = @transform_13, window_bounds = array<i64: 32, 64>}, {pipeline_mode = #tpu.pipeline_mode<synchronous>, transform_indices = @transform_14, window_bounds = array<i64: 8, 64>}, {pipeline_mode = #tpu.pipeline_mode<synchronous>, transform_indices = @transform_15, window_bounds = array<i64: 64, 128>}, {pipeline_mode = #tpu.pipeline_mode<synchronous>, transform_indices = @transform_16, window_bounds = array<i64: 16, 128>}, {transform_indices = @transform_17, window_bounds = array<i64: 1, 2, 128>}]} {
    %c0 = arith.constant 0 : index
    %c0_0 = arith.constant 0 : index
    %0 = vector.load %arg17[%c0, %c0_0] : memref<16x128xf32, #tpu.memory_space<vmem>>, vector<16x128xf32>
    %c0_1 = arith.constant 0 : index
    %c0_2 = arith.constant 0 : index
    %c0_3 = arith.constant 0 : index
    %1 = vector.load %arg1[%c0_1, %c0_2, %c0_3] : memref<1x16x3xf32, #tpu.memory_space<vmem>>, vector<1x16x3xf32>
    %2 = vector.shape_cast %1 : vector<1x16x3xf32> to vector<16x3xf32>
    %c0_4 = arith.constant 0 : index
    %c0_5 = arith.constant 0 : index
    %3 = vector.load %arg7[%c0_4, %c0_5] : memref<3x32xf32, #tpu.memory_space<vmem>>, vector<3x32xf32>
    %cst = arith.constant dense<0.000000e+00> : vector<16x32xf32>
    %4 = tpu.matmul %2, %3, %cst {dimension_numbers = #tpu.dot_dimension_numbers<[1], [0], [0], [1], [0, 0, 1, 1], [], []>} : vector<16x3xf32>, vector<3x32xf32>, vector<16x32xf32> -> vector<16x32xf32>
    %c0_6 = arith.constant 0 : index
    %c0_7 = arith.constant 0 : index
    %5 = vector.load %arg2[%c0_6, %c0_7] : memref<16x32xf32, #tpu.memory_space<vmem>>, vector<16x32xf32>
    %6 = arith.addf %4, %5 : vector<16x32xf32>
    %c0_8 = arith.constant 0 : index
    %c0_9 = arith.constant 0 : index
    %7 = vector.load %arg8[%c0_8, %c0_9] : memref<32x192xf32, #tpu.memory_space<vmem>>, vector<32x192xf32>
    %cst_10 = arith.constant dense<0.000000e+00> : vector<16x192xf32>
    %8 = tpu.matmul %6, %7, %cst_10 {dimension_numbers = #tpu.dot_dimension_numbers<[1], [0], [0], [1], [0, 0, 1, 1], [], []>} : vector<16x32xf32>, vector<32x192xf32>, vector<16x192xf32> -> vector<16x192xf32>
    %9 = vector.extract_strided_slice %8 {offsets = [0, 128], sizes = [16, 64], strides = [1, 1]} : vector<16x192xf32> to vector<16x64xf32>
    %10 = vector.extract_strided_slice %0 {offsets = [0, 0], sizes = [1, 64], strides = [1, 1]} : vector<16x128xf32> to vector<1x64xf32>
    %11 = vector.broadcast %10 : vector<1x64xf32> to vector<16x64xf32>
    %12 = arith.addf %9, %11 : vector<16x64xf32>
    %c0_11 = arith.constant 0 : index
    %c0_12 = arith.constant 0 : index
    %13 = vector.load %arg5[%c0_11, %c0_12] : memref<16x16xf32, #tpu.memory_space<vmem>>, vector<16x16xf32>
    %14 = vector.extract_strided_slice %12 {offsets = [0, 0], sizes = [16, 8], strides = [1, 1]} : vector<16x64xf32> to vector<16x8xf32>
    %15 = vector.extract_strided_slice %12 {offsets = [0, 32], sizes = [16, 8], strides = [1, 1]} : vector<16x64xf32> to vector<16x8xf32>
    %cst_13 = arith.constant dense<0.000000e+00> : vector<16x16xf32>
    %16 = tpu.matmul %14, %15, %cst_13 {dimension_numbers = #tpu.dot_dimension_numbers<[1], [1], [0], [0], [0, 0, 1, 0], [], []>} : vector<16x8xf32>, vector<16x8xf32>, vector<16x16xf32> -> vector<16x16xf32>
    %17 = arith.addf %16, %13 : vector<16x16xf32>
    %cst_14 = arith.constant dense<0xFF800000> : vector<16xf32>
    %18 = vector.multi_reduction <maximumf>, %17, %cst_14 [1] : vector<16x16xf32> to vector<16xf32>
    %19 = vector.shape_cast %18 : vector<16xf32> to vector<16x1xf32>
    %20 = vector.broadcast %19 : vector<16x1xf32> to vector<16x16xf32>
    %21 = arith.subf %17, %20 : vector<16x16xf32>
    %22 = math.exp %21 : vector<16x16xf32>
    %cst_15 = arith.constant dense<0.000000e+00> : vector<16xf32>
    %23 = vector.multi_reduction <add>, %22, %cst_15 [1] : vector<16x16xf32> to vector<16xf32>
    %24 = vector.shape_cast %23 : vector<16xf32> to vector<16x1xf32>
    %25 = tpu.reciprocal %24 {approx = true} : vector<16x1xf32> -> vector<16x1xf32>
    %26 = vector.broadcast %25 : vector<16x1xf32> to vector<16x16xf32>
    %27 = arith.mulf %22, %26 : vector<16x16xf32>
    %28 = vector.extract_strided_slice %8 {offsets = [0, 0], sizes = [16, 32], strides = [1, 1]} : vector<16x192xf32> to vector<16x32xf32>
    %cst_16 = arith.constant dense<0.000000e+00> : vector<16x32xf32>
    %29 = tpu.matmul %27, %28, %cst_16 {dimension_numbers = #tpu.dot_dimension_numbers<[1], [0], [0], [1], [0, 0, 1, 1], [], []>} : vector<16x16xf32>, vector<16x32xf32>, vector<16x32xf32> -> vector<16x32xf32>
    %30 = vector.extract_strided_slice %12 {offsets = [0, 8], sizes = [16, 8], strides = [1, 1]} : vector<16x64xf32> to vector<16x8xf32>
    %31 = vector.extract_strided_slice %12 {offsets = [0, 40], sizes = [16, 8], strides = [1, 1]} : vector<16x64xf32> to vector<16x8xf32>
    %cst_17 = arith.constant dense<0.000000e+00> : vector<16x16xf32>
    %32 = tpu.matmul %30, %31, %cst_17 {dimension_numbers = #tpu.dot_dimension_numbers<[1], [1], [0], [0], [0, 0, 1, 0], [], []>} : vector<16x8xf32>, vector<16x8xf32>, vector<16x16xf32> -> vector<16x16xf32>
    %33 = arith.addf %32, %13 : vector<16x16xf32>
    %cst_18 = arith.constant dense<0xFF800000> : vector<16xf32>
    %34 = vector.multi_reduction <maximumf>, %33, %cst_18 [1] : vector<16x16xf32> to vector<16xf32>
    %35 = vector.shape_cast %34 : vector<16xf32> to vector<16x1xf32>
    %36 = vector.broadcast %35 : vector<16x1xf32> to vector<16x16xf32>
    %37 = arith.subf %33, %36 : vector<16x16xf32>
    %38 = math.exp %37 : vector<16x16xf32>
    %cst_19 = arith.constant dense<0.000000e+00> : vector<16xf32>
    %39 = vector.multi_reduction <add>, %38, %cst_19 [1] : vector<16x16xf32> to vector<16xf32>
    %40 = vector.shape_cast %39 : vector<16xf32> to vector<16x1xf32>
    %41 = tpu.reciprocal %40 {approx = true} : vector<16x1xf32> -> vector<16x1xf32>
    %42 = vector.broadcast %41 : vector<16x1xf32> to vector<16x16xf32>
    %43 = arith.mulf %38, %42 : vector<16x16xf32>
    %44 = vector.extract_strided_slice %8 {offsets = [0, 32], sizes = [16, 32], strides = [1, 1]} : vector<16x192xf32> to vector<16x32xf32>
    %cst_20 = arith.constant dense<0.000000e+00> : vector<16x32xf32>
    %45 = tpu.matmul %43, %44, %cst_20 {dimension_numbers = #tpu.dot_dimension_numbers<[1], [0], [0], [1], [0, 0, 1, 1], [], []>} : vector<16x16xf32>, vector<16x32xf32>, vector<16x32xf32> -> vector<16x32xf32>
    %46 = arith.addf %29, %45 : vector<16x32xf32>
    %47 = vector.extract_strided_slice %12 {offsets = [0, 16], sizes = [16, 8], strides = [1, 1]} : vector<16x64xf32> to vector<16x8xf32>
    %48 = vector.extract_strided_slice %12 {offsets = [0, 48], sizes = [16, 8], strides = [1, 1]} : vector<16x64xf32> to vector<16x8xf32>
    %cst_21 = arith.constant dense<0.000000e+00> : vector<16x16xf32>
    %49 = tpu.matmul %47, %48, %cst_21 {dimension_numbers = #tpu.dot_dimension_numbers<[1], [1], [0], [0], [0, 0, 1, 0], [], []>} : vector<16x8xf32>, vector<16x8xf32>, vector<16x16xf32> -> vector<16x16xf32>
    %50 = arith.addf %49, %13 : vector<16x16xf32>
    %cst_22 = arith.constant dense<0xFF800000> : vector<16xf32>
    %51 = vector.multi_reduction <maximumf>, %50, %cst_22 [1] : vector<16x16xf32> to vector<16xf32>
    %52 = vector.shape_cast %51 : vector<16xf32> to vector<16x1xf32>
    %53 = vector.broadcast %52 : vector<16x1xf32> to vector<16x16xf32>
    %54 = arith.subf %50, %53 : vector<16x16xf32>
    %55 = math.exp %54 : vector<16x16xf32>
    %cst_23 = arith.constant dense<0.000000e+00> : vector<16xf32>
    %56 = vector.multi_reduction <add>, %55, %cst_23 [1] : vector<16x16xf32> to vector<16xf32>
    %57 = vector.shape_cast %56 : vector<16xf32> to vector<16x1xf32>
    %58 = tpu.reciprocal %57 {approx = true} : vector<16x1xf32> -> vector<16x1xf32>
    %59 = vector.broadcast %58 : vector<16x1xf32> to vector<16x16xf32>
    %60 = arith.mulf %55, %59 : vector<16x16xf32>
    %61 = vector.extract_strided_slice %8 {offsets = [0, 64], sizes = [16, 32], strides = [1, 1]} : vector<16x192xf32> to vector<16x32xf32>
    %cst_24 = arith.constant dense<0.000000e+00> : vector<16x32xf32>
    %62 = tpu.matmul %60, %61, %cst_24 {dimension_numbers = #tpu.dot_dimension_numbers<[1], [0], [0], [1], [0, 0, 1, 1], [], []>} : vector<16x16xf32>, vector<16x32xf32>, vector<16x32xf32> -> vector<16x32xf32>
    %63 = arith.addf %46, %62 : vector<16x32xf32>
    %64 = vector.extract_strided_slice %12 {offsets = [0, 24], sizes = [16, 8], strides = [1, 1]} : vector<16x64xf32> to vector<16x8xf32>
    %65 = vector.extract_strided_slice %12 {offsets = [0, 56], sizes = [16, 8], strides = [1, 1]} : vector<16x64xf32> to vector<16x8xf32>
    %cst_25 = arith.constant dense<0.000000e+00> : vector<16x16xf32>
    %66 = tpu.matmul %64, %65, %cst_25 {dimension_numbers = #tpu.dot_dimension_numbers<[1], [1], [0], [0], [0, 0, 1, 0], [], []>} : vector<16x8xf32>, vector<16x8xf32>, vector<16x16xf32> -> vector<16x16xf32>
    %67 = arith.addf %66, %13 : vector<16x16xf32>
    %cst_26 = arith.constant dense<0xFF800000> : vector<16xf32>
    %68 = vector.multi_reduction <maximumf>, %67, %cst_26 [1] : vector<16x16xf32> to vector<16xf32>
    %69 = vector.shape_cast %68 : vector<16xf32> to vector<16x1xf32>
    %70 = vector.broadcast %69 : vector<16x1xf32> to vector<16x16xf32>
    %71 = arith.subf %67, %70 : vector<16x16xf32>
    %72 = math.exp %71 : vector<16x16xf32>
    %cst_27 = arith.constant dense<0.000000e+00> : vector<16xf32>
    %73 = vector.multi_reduction <add>, %72, %cst_27 [1] : vector<16x16xf32> to vector<16xf32>
    %74 = vector.shape_cast %73 : vector<16xf32> to vector<16x1xf32>
    %75 = tpu.reciprocal %74 {approx = true} : vector<16x1xf32> -> vector<16x1xf32>
    %76 = vector.broadcast %75 : vector<16x1xf32> to vector<16x16xf32>
    %77 = arith.mulf %72, %76 : vector<16x16xf32>
    %78 = vector.extract_strided_slice %8 {offsets = [0, 96], sizes = [16, 32], strides = [1, 1]} : vector<16x192xf32> to vector<16x32xf32>
    %cst_28 = arith.constant dense<0.000000e+00> : vector<16x32xf32>
    %79 = tpu.matmul %77, %78, %cst_28 {dimension_numbers = #tpu.dot_dimension_numbers<[1], [0], [0], [1], [0, 0, 1, 1], [], []>} : vector<16x16xf32>, vector<16x32xf32>, vector<16x32xf32> -> vector<16x32xf32>
    %80 = arith.addf %63, %79 : vector<16x32xf32>
    %81 = vector.extract_strided_slice %0 {offsets = [1, 0], sizes = [1, 32], strides = [1, 1]} : vector<16x128xf32> to vector<1x32xf32>
    %82 = vector.broadcast %81 : vector<1x32xf32> to vector<16x32xf32>
    %83 = arith.addf %80, %82 : vector<16x32xf32>
    %84 = arith.addf %6, %83 : vector<16x32xf32>
    %85 = vector.extract_strided_slice %0 {offsets = [2, 0], sizes = [1, 32], strides = [1, 1]} : vector<16x128xf32> to vector<1x32xf32>
    %86 = vector.extract_strided_slice %0 {offsets = [3, 0], sizes = [1, 32], strides = [1, 1]} : vector<16x128xf32> to vector<1x32xf32>
    %cst_29 = arith.constant dense<0.000000e+00> : vector<16xf32>
    %87 = vector.multi_reduction <add>, %84, %cst_29 [1] : vector<16x32xf32> to vector<16xf32>
    %88 = vector.shape_cast %87 : vector<16xf32> to vector<16x1xf32>
    %cst_30 = arith.constant 3.200000e+01 : f32
    %89 = vector.broadcast %cst_30 : f32 to vector<16x1xf32>
    %90 = arith.divf %88, %89 : vector<16x1xf32>
    %91 = vector.broadcast %90 : vector<16x1xf32> to vector<16x32xf32>
    %92 = arith.subf %84, %91 : vector<16x32xf32>
    %93 = arith.mulf %92, %92 : vector<16x32xf32>
    %cst_31 = arith.constant dense<0.000000e+00> : vector<16xf32>
    %94 = vector.multi_reduction <add>, %93, %cst_31 [1] : vector<16x32xf32> to vector<16xf32>
    %95 = vector.shape_cast %94 : vector<16xf32> to vector<16x1xf32>
    %cst_32 = arith.constant 3.200000e+01 : f32
    %96 = vector.broadcast %cst_32 : f32 to vector<16x1xf32>
    %97 = arith.divf %95, %96 : vector<16x1xf32>
    %98 = vector.broadcast %90 : vector<16x1xf32> to vector<16x32xf32>
    %99 = arith.subf %84, %98 : vector<16x32xf32>
    %cst_33 = arith.constant 9.99999974E-6 : f32
    %100 = vector.broadcast %cst_33 : f32 to vector<16x1xf32>
    %101 = arith.addf %97, %100 : vector<16x1xf32>
    %102 = math.rsqrt %101 : vector<16x1xf32>
    %103 = vector.broadcast %102 : vector<16x1xf32> to vector<16x32xf32>
    %104 = arith.mulf %99, %103 : vector<16x32xf32>
    %105 = vector.broadcast %85 : vector<1x32xf32> to vector<16x32xf32>
    %106 = arith.mulf %104, %105 : vector<16x32xf32>
    %107 = vector.broadcast %86 : vector<1x32xf32> to vector<16x32xf32>
    %108 = arith.addf %106, %107 : vector<16x32xf32>
    %c0_34 = arith.constant 0 : index
    %c0_35 = arith.constant 0 : index
    %109 = vector.load %arg9[%c0_34, %c0_35] : memref<32x64xf32, #tpu.memory_space<vmem>>, vector<32x64xf32>
    %cst_36 = arith.constant dense<0.000000e+00> : vector<16x64xf32>
    %110 = tpu.matmul %108, %109, %cst_36 {dimension_numbers = #tpu.dot_dimension_numbers<[1], [0], [0], [1], [0, 0, 1, 1], [], []>} : vector<16x32xf32>, vector<32x64xf32>, vector<16x64xf32> -> vector<16x64xf32>
    %111 = vector.extract_strided_slice %0 {offsets = [4, 0], sizes = [1, 64], strides = [1, 1]} : vector<16x128xf32> to vector<1x64xf32>
    %112 = vector.broadcast %111 : vector<1x64xf32> to vector<16x64xf32>
    %113 = arith.addf %110, %112 : vector<16x64xf32>
    %cst_37 = arith.constant 0.000000e+00 : f32
    %114 = vector.broadcast %cst_37 : f32 to vector<16x64xf32>
    %115 = arith.maximumf %113, %114 : vector<16x64xf32>
    %c0_38 = arith.constant 0 : index
    %c0_39 = arith.constant 0 : index
    %116 = vector.load %arg10[%c0_38, %c0_39] : memref<64x32xf32, #tpu.memory_space<vmem>>, vector<64x32xf32>
    %cst_40 = arith.constant dense<0.000000e+00> : vector<16x32xf32>
    %117 = tpu.matmul %115, %116, %cst_40 {dimension_numbers = #tpu.dot_dimension_numbers<[1], [0], [0], [1], [0, 0, 1, 1], [], []>} : vector<16x64xf32>, vector<64x32xf32>, vector<16x32xf32> -> vector<16x32xf32>
    %118 = vector.extract_strided_slice %0 {offsets = [5, 0], sizes = [1, 32], strides = [1, 1]} : vector<16x128xf32> to vector<1x32xf32>
    %119 = vector.broadcast %118 : vector<1x32xf32> to vector<16x32xf32>
    %120 = arith.addf %117, %119 : vector<16x32xf32>
    %121 = arith.addf %108, %120 : vector<16x32xf32>
    %122 = vector.extract_strided_slice %0 {offsets = [6, 0], sizes = [1, 32], strides = [1, 1]} : vector<16x128xf32> to vector<1x32xf32>
    %123 = vector.extract_strided_slice %0 {offsets = [7, 0], sizes = [1, 32], strides = [1, 1]} : vector<16x128xf32> to vector<1x32xf32>
    %cst_41 = arith.constant dense<0.000000e+00> : vector<16xf32>
    %124 = vector.multi_reduction <add>, %121, %cst_41 [1] : vector<16x32xf32> to vector<16xf32>
    %125 = vector.shape_cast %124 : vector<16xf32> to vector<16x1xf32>
    %cst_42 = arith.constant 3.200000e+01 : f32
    %126 = vector.broadcast %cst_42 : f32 to vector<16x1xf32>
    %127 = arith.divf %125, %126 : vector<16x1xf32>
    %128 = vector.broadcast %127 : vector<16x1xf32> to vector<16x32xf32>
    %129 = arith.subf %121, %128 : vector<16x32xf32>
    %130 = arith.mulf %129, %129 : vector<16x32xf32>
    %cst_43 = arith.constant dense<0.000000e+00> : vector<16xf32>
    %131 = vector.multi_reduction <add>, %130, %cst_43 [1] : vector<16x32xf32> to vector<16xf32>
    %132 = vector.shape_cast %131 : vector<16xf32> to vector<16x1xf32>
    %cst_44 = arith.constant 3.200000e+01 : f32
    %133 = vector.broadcast %cst_44 : f32 to vector<16x1xf32>
    %134 = arith.divf %132, %133 : vector<16x1xf32>
    %135 = vector.broadcast %127 : vector<16x1xf32> to vector<16x32xf32>
    %136 = arith.subf %121, %135 : vector<16x32xf32>
    %cst_45 = arith.constant 9.99999974E-6 : f32
    %137 = vector.broadcast %cst_45 : f32 to vector<16x1xf32>
    %138 = arith.addf %134, %137 : vector<16x1xf32>
    %139 = math.rsqrt %138 : vector<16x1xf32>
    %140 = vector.broadcast %139 : vector<16x1xf32> to vector<16x32xf32>
    %141 = arith.mulf %136, %140 : vector<16x32xf32>
    %142 = vector.broadcast %122 : vector<1x32xf32> to vector<16x32xf32>
    %143 = arith.mulf %141, %142 : vector<16x32xf32>
    %144 = vector.broadcast %123 : vector<1x32xf32> to vector<16x32xf32>
    %145 = arith.addf %143, %144 : vector<16x32xf32>
    %c0_46 = arith.constant 0 : index
    %c0_47 = arith.constant 0 : index
    %146 = vector.load %arg6[%c0_46, %c0_47] : memref<2x16xf32, #tpu.memory_space<vmem>>, vector<2x16xf32>
    %cst_48 = arith.constant dense<0.000000e+00> : vector<2x32xf32>
    %147 = tpu.matmul %146, %145, %cst_48 {dimension_numbers = #tpu.dot_dimension_numbers<[1], [0], [0], [1], [0, 0, 1, 1], [], []>} : vector<2x16xf32>, vector<16x32xf32>, vector<2x32xf32> -> vector<2x32xf32>
    %c0_49 = arith.constant 0 : index
    %c0_50 = arith.constant 0 : index
    %c0_51 = arith.constant 0 : index
    %148 = vector.load %arg4[%c0_49, %c0_50, %c0_51] : memref<1x2x2xf32, #tpu.memory_space<vmem>>, vector<1x2x2xf32>
    %149 = vector.shape_cast %148 : vector<1x2x2xf32> to vector<2x2xf32>
    %c0_52 = arith.constant 0 : index
    %c0_53 = arith.constant 0 : index
    %c0_54 = arith.constant 0 : index
    %150 = vector.load %arg11[%c0_52, %c0_53, %c0_54] : memref<2x32x66xf32, #tpu.memory_space<vmem>>, vector<1x32x66xf32>
    %151 = vector.shape_cast %150 : vector<1x32x66xf32> to vector<32x66xf32>
    %c0_55 = arith.constant 0 : index
    %c0_56 = arith.constant 0 : index
    %c0_57 = arith.constant 0 : index
    %152 = vector.load %arg12[%c0_55, %c0_56, %c0_57] : memref<2x2x32xf32, #tpu.memory_space<vmem>>, vector<1x2x32xf32>
    %153 = vector.shape_cast %152 : vector<1x2x32xf32> to vector<2x32xf32>
    %cst_58 = arith.constant dense<0.000000e+00> : vector<2x66xf32>
    %154 = tpu.matmul %147, %151, %cst_58 {dimension_numbers = #tpu.dot_dimension_numbers<[1], [0], [0], [1], [0, 0, 1, 1], [], []>} : vector<2x32xf32>, vector<32x66xf32>, vector<2x66xf32> -> vector<2x66xf32>
    %cst_59 = arith.constant dense<0.000000e+00> : vector<2x2xf32>
    %155 = tpu.matmul %153, %147, %cst_59 {dimension_numbers = #tpu.dot_dimension_numbers<[1], [1], [0], [0], [0, 0, 1, 0], [], []>} : vector<2x32xf32>, vector<2x32xf32>, vector<2x2xf32> -> vector<2x2xf32>
    %156 = vector.extract_strided_slice %154 {offsets = [0, 0], sizes = [2, 32], strides = [1, 1]} : vector<2x66xf32> to vector<2x32xf32>
    %157 = vector.extract_strided_slice %154 {offsets = [0, 64], sizes = [2, 1], strides = [1, 1]} : vector<2x66xf32> to vector<2x1xf32>
    %158 = vector.extract_strided_slice %155 {offsets = [0, 0], sizes = [1, 2], strides = [1, 1]} : vector<2x2xf32> to vector<1x2xf32>
    %159 = vector.broadcast %157 : vector<2x1xf32> to vector<2x2xf32>
    %160 = vector.broadcast %158 : vector<1x2xf32> to vector<2x2xf32>
    %161 = arith.addf %159, %160 : vector<2x2xf32>
    %cst_60 = arith.constant 0.000000e+00 : f32
    %162 = vector.broadcast %cst_60 : f32 to vector<2x2xf32>
    %163 = arith.cmpf ogt, %161, %162 : vector<2x2xf32>
    %cst_61 = arith.constant 2.000000e-01 : f32
    %164 = vector.broadcast %cst_61 : f32 to vector<2x2xf32>
    %165 = arith.mulf %164, %161 : vector<2x2xf32>
    %166 = arith.select %163, %161, %165 : vector<2x2xi1>, vector<2x2xf32>
    %cst_62 = arith.constant 0.000000e+00 : f32
    %167 = vector.broadcast %cst_62 : f32 to vector<2x2xf32>
    %168 = arith.cmpf ogt, %149, %167 : vector<2x2xf32>
    %cst_63 = arith.constant -9.000000e+15 : f32
    %169 = vector.broadcast %cst_63 : f32 to vector<2x2xf32>
    %170 = arith.select %168, %166, %169 : vector<2x2xi1>, vector<2x2xf32>
    %cst_64 = arith.constant dense<0xFF800000> : vector<2xf32>
    %171 = vector.multi_reduction <maximumf>, %170, %cst_64 [1] : vector<2x2xf32> to vector<2xf32>
    %172 = vector.shape_cast %171 : vector<2xf32> to vector<2x1xf32>
    %173 = vector.broadcast %172 : vector<2x1xf32> to vector<2x2xf32>
    %174 = arith.subf %170, %173 : vector<2x2xf32>
    %175 = math.exp %174 : vector<2x2xf32>
    %cst_65 = arith.constant dense<0.000000e+00> : vector<2xf32>
    %176 = vector.multi_reduction <add>, %175, %cst_65 [1] : vector<2x2xf32> to vector<2xf32>
    %177 = vector.shape_cast %176 : vector<2xf32> to vector<2x1xf32>
    %178 = tpu.reciprocal %177 {approx = true} : vector<2x1xf32> -> vector<2x1xf32>
    %179 = vector.broadcast %178 : vector<2x1xf32> to vector<2x2xf32>
    %180 = arith.mulf %175, %179 : vector<2x2xf32>
    %cst_66 = arith.constant dense<0.000000e+00> : vector<2x32xf32>
    %181 = tpu.matmul %180, %156, %cst_66 {dimension_numbers = #tpu.dot_dimension_numbers<[1], [0], [0], [1], [0, 0, 1, 1], [], []>} : vector<2x2xf32>, vector<2x32xf32>, vector<2x32xf32> -> vector<2x32xf32>
    %182 = vector.extract_strided_slice %154 {offsets = [0, 32], sizes = [2, 32], strides = [1, 1]} : vector<2x66xf32> to vector<2x32xf32>
    %183 = vector.extract_strided_slice %154 {offsets = [0, 65], sizes = [2, 1], strides = [1, 1]} : vector<2x66xf32> to vector<2x1xf32>
    %184 = vector.extract_strided_slice %155 {offsets = [1, 0], sizes = [1, 2], strides = [1, 1]} : vector<2x2xf32> to vector<1x2xf32>
    %185 = vector.broadcast %183 : vector<2x1xf32> to vector<2x2xf32>
    %186 = vector.broadcast %184 : vector<1x2xf32> to vector<2x2xf32>
    %187 = arith.addf %185, %186 : vector<2x2xf32>
    %cst_67 = arith.constant 0.000000e+00 : f32
    %188 = vector.broadcast %cst_67 : f32 to vector<2x2xf32>
    %189 = arith.cmpf ogt, %187, %188 : vector<2x2xf32>
    %cst_68 = arith.constant 2.000000e-01 : f32
    %190 = vector.broadcast %cst_68 : f32 to vector<2x2xf32>
    %191 = arith.mulf %190, %187 : vector<2x2xf32>
    %192 = arith.select %189, %187, %191 : vector<2x2xi1>, vector<2x2xf32>
    %cst_69 = arith.constant 0.000000e+00 : f32
    %193 = vector.broadcast %cst_69 : f32 to vector<2x2xf32>
    %194 = arith.cmpf ogt, %149, %193 : vector<2x2xf32>
    %cst_70 = arith.constant -9.000000e+15 : f32
    %195 = vector.broadcast %cst_70 : f32 to vector<2x2xf32>
    %196 = arith.select %194, %192, %195 : vector<2x2xi1>, vector<2x2xf32>
    %cst_71 = arith.constant dense<0xFF800000> : vector<2xf32>
    %197 = vector.multi_reduction <maximumf>, %196, %cst_71 [1] : vector<2x2xf32> to vector<2xf32>
    %198 = vector.shape_cast %197 : vector<2xf32> to vector<2x1xf32>
    %199 = vector.broadcast %198 : vector<2x1xf32> to vector<2x2xf32>
    %200 = arith.subf %196, %199 : vector<2x2xf32>
    %201 = math.exp %200 : vector<2x2xf32>
    %cst_72 = arith.constant dense<0.000000e+00> : vector<2xf32>
    %202 = vector.multi_reduction <add>, %201, %cst_72 [1] : vector<2x2xf32> to vector<2xf32>
    %203 = vector.shape_cast %202 : vector<2xf32> to vector<2x1xf32>
    %204 = tpu.reciprocal %203 {approx = true} : vector<2x1xf32> -> vector<2x1xf32>
    %205 = vector.broadcast %204 : vector<2x1xf32> to vector<2x2xf32>
    %206 = arith.mulf %201, %205 : vector<2x2xf32>
    %cst_73 = arith.constant dense<0.000000e+00> : vector<2x32xf32>
    %207 = tpu.matmul %206, %182, %cst_73 {dimension_numbers = #tpu.dot_dimension_numbers<[1], [0], [0], [1], [0, 0, 1, 1], [], []>} : vector<2x2xf32>, vector<2x32xf32>, vector<2x32xf32> -> vector<2x32xf32>
    %208 = arith.addf %181, %207 : vector<2x32xf32>
    %cst_74 = arith.constant 5.000000e-01 : f32
    %209 = vector.broadcast %cst_74 : f32 to vector<2x32xf32>
    %210 = arith.mulf %208, %209 : vector<2x32xf32>
    %cst_75 = arith.constant 0.000000e+00 : f32
    %211 = vector.broadcast %cst_75 : f32 to vector<2x32xf32>
    %212 = arith.cmpf ogt, %210, %211 : vector<2x32xf32>
    %213 = math.exp %210 : vector<2x32xf32>
    %cst_76 = arith.constant 1.000000e+00 : f32
    %214 = vector.broadcast %cst_76 : f32 to vector<2x32xf32>
    %215 = arith.subf %213, %214 : vector<2x32xf32>
    %216 = arith.select %212, %210, %215 : vector<2x32xi1>, vector<2x32xf32>
    %c1 = arith.constant 1 : index
    %c0_77 = arith.constant 0 : index
    %c0_78 = arith.constant 0 : index
    %217 = vector.load %arg11[%c1, %c0_77, %c0_78] : memref<2x32x66xf32, #tpu.memory_space<vmem>>, vector<1x32x66xf32>
    %218 = vector.shape_cast %217 : vector<1x32x66xf32> to vector<32x66xf32>
    %c1_79 = arith.constant 1 : index
    %c0_80 = arith.constant 0 : index
    %c0_81 = arith.constant 0 : index
    %219 = vector.load %arg12[%c1_79, %c0_80, %c0_81] : memref<2x2x32xf32, #tpu.memory_space<vmem>>, vector<1x2x32xf32>
    %220 = vector.shape_cast %219 : vector<1x2x32xf32> to vector<2x32xf32>
    %cst_82 = arith.constant dense<0.000000e+00> : vector<2x66xf32>
    %221 = tpu.matmul %216, %218, %cst_82 {dimension_numbers = #tpu.dot_dimension_numbers<[1], [0], [0], [1], [0, 0, 1, 1], [], []>} : vector<2x32xf32>, vector<32x66xf32>, vector<2x66xf32> -> vector<2x66xf32>
    %cst_83 = arith.constant dense<0.000000e+00> : vector<2x2xf32>
    %222 = tpu.matmul %220, %216, %cst_83 {dimension_numbers = #tpu.dot_dimension_numbers<[1], [1], [0], [0], [0, 0, 1, 0], [], []>} : vector<2x32xf32>, vector<2x32xf32>, vector<2x2xf32> -> vector<2x2xf32>
    %223 = vector.extract_strided_slice %221 {offsets = [0, 0], sizes = [2, 32], strides = [1, 1]} : vector<2x66xf32> to vector<2x32xf32>
    %224 = vector.extract_strided_slice %221 {offsets = [0, 64], sizes = [2, 1], strides = [1, 1]} : vector<2x66xf32> to vector<2x1xf32>
    %225 = vector.extract_strided_slice %222 {offsets = [0, 0], sizes = [1, 2], strides = [1, 1]} : vector<2x2xf32> to vector<1x2xf32>
    %226 = vector.broadcast %224 : vector<2x1xf32> to vector<2x2xf32>
    %227 = vector.broadcast %225 : vector<1x2xf32> to vector<2x2xf32>
    %228 = arith.addf %226, %227 : vector<2x2xf32>
    %cst_84 = arith.constant 0.000000e+00 : f32
    %229 = vector.broadcast %cst_84 : f32 to vector<2x2xf32>
    %230 = arith.cmpf ogt, %228, %229 : vector<2x2xf32>
    %cst_85 = arith.constant 2.000000e-01 : f32
    %231 = vector.broadcast %cst_85 : f32 to vector<2x2xf32>
    %232 = arith.mulf %231, %228 : vector<2x2xf32>
    %233 = arith.select %230, %228, %232 : vector<2x2xi1>, vector<2x2xf32>
    %cst_86 = arith.constant 0.000000e+00 : f32
    %234 = vector.broadcast %cst_86 : f32 to vector<2x2xf32>
    %235 = arith.cmpf ogt, %149, %234 : vector<2x2xf32>
    %cst_87 = arith.constant -9.000000e+15 : f32
    %236 = vector.broadcast %cst_87 : f32 to vector<2x2xf32>
    %237 = arith.select %235, %233, %236 : vector<2x2xi1>, vector<2x2xf32>
    %cst_88 = arith.constant dense<0xFF800000> : vector<2xf32>
    %238 = vector.multi_reduction <maximumf>, %237, %cst_88 [1] : vector<2x2xf32> to vector<2xf32>
    %239 = vector.shape_cast %238 : vector<2xf32> to vector<2x1xf32>
    %240 = vector.broadcast %239 : vector<2x1xf32> to vector<2x2xf32>
    %241 = arith.subf %237, %240 : vector<2x2xf32>
    %242 = math.exp %241 : vector<2x2xf32>
    %cst_89 = arith.constant dense<0.000000e+00> : vector<2xf32>
    %243 = vector.multi_reduction <add>, %242, %cst_89 [1] : vector<2x2xf32> to vector<2xf32>
    %244 = vector.shape_cast %243 : vector<2xf32> to vector<2x1xf32>
    %245 = tpu.reciprocal %244 {approx = true} : vector<2x1xf32> -> vector<2x1xf32>
    %246 = vector.broadcast %245 : vector<2x1xf32> to vector<2x2xf32>
    %247 = arith.mulf %242, %246 : vector<2x2xf32>
    %cst_90 = arith.constant dense<0.000000e+00> : vector<2x32xf32>
    %248 = tpu.matmul %247, %223, %cst_90 {dimension_numbers = #tpu.dot_dimension_numbers<[1], [0], [0], [1], [0, 0, 1, 1], [], []>} : vector<2x2xf32>, vector<2x32xf32>, vector<2x32xf32> -> vector<2x32xf32>
    %249 = vector.extract_strided_slice %221 {offsets = [0, 32], sizes = [2, 32], strides = [1, 1]} : vector<2x66xf32> to vector<2x32xf32>
    %250 = vector.extract_strided_slice %221 {offsets = [0, 65], sizes = [2, 1], strides = [1, 1]} : vector<2x66xf32> to vector<2x1xf32>
    %251 = vector.extract_strided_slice %222 {offsets = [1, 0], sizes = [1, 2], strides = [1, 1]} : vector<2x2xf32> to vector<1x2xf32>
    %252 = vector.broadcast %250 : vector<2x1xf32> to vector<2x2xf32>
    %253 = vector.broadcast %251 : vector<1x2xf32> to vector<2x2xf32>
    %254 = arith.addf %252, %253 : vector<2x2xf32>
    %cst_91 = arith.constant 0.000000e+00 : f32
    %255 = vector.broadcast %cst_91 : f32 to vector<2x2xf32>
    %256 = arith.cmpf ogt, %254, %255 : vector<2x2xf32>
    %cst_92 = arith.constant 2.000000e-01 : f32
    %257 = vector.broadcast %cst_92 : f32 to vector<2x2xf32>
    %258 = arith.mulf %257, %254 : vector<2x2xf32>
    %259 = arith.select %256, %254, %258 : vector<2x2xi1>, vector<2x2xf32>
    %cst_93 = arith.constant 0.000000e+00 : f32
    %260 = vector.broadcast %cst_93 : f32 to vector<2x2xf32>
    %261 = arith.cmpf ogt, %149, %260 : vector<2x2xf32>
    %cst_94 = arith.constant -9.000000e+15 : f32
    %262 = vector.broadcast %cst_94 : f32 to vector<2x2xf32>
    %263 = arith.select %261, %259, %262 : vector<2x2xi1>, vector<2x2xf32>
    %cst_95 = arith.constant dense<0xFF800000> : vector<2xf32>
    %264 = vector.multi_reduction <maximumf>, %263, %cst_95 [1] : vector<2x2xf32> to vector<2xf32>
    %265 = vector.shape_cast %264 : vector<2xf32> to vector<2x1xf32>
    %266 = vector.broadcast %265 : vector<2x1xf32> to vector<2x2xf32>
    %267 = arith.subf %263, %266 : vector<2x2xf32>
    %268 = math.exp %267 : vector<2x2xf32>
    %cst_96 = arith.constant dense<0.000000e+00> : vector<2xf32>
    %269 = vector.multi_reduction <add>, %268, %cst_96 [1] : vector<2x2xf32> to vector<2xf32>
    %270 = vector.shape_cast %269 : vector<2xf32> to vector<2x1xf32>
    %271 = tpu.reciprocal %270 {approx = true} : vector<2x1xf32> -> vector<2x1xf32>
    %272 = vector.broadcast %271 : vector<2x1xf32> to vector<2x2xf32>
    %273 = arith.mulf %268, %272 : vector<2x2xf32>
    %cst_97 = arith.constant dense<0.000000e+00> : vector<2x32xf32>
    %274 = tpu.matmul %273, %249, %cst_97 {dimension_numbers = #tpu.dot_dimension_numbers<[1], [0], [0], [1], [0, 0, 1, 1], [], []>} : vector<2x2xf32>, vector<2x32xf32>, vector<2x32xf32> -> vector<2x32xf32>
    %275 = arith.addf %248, %274 : vector<2x32xf32>
    %cst_98 = arith.constant 5.000000e-01 : f32
    %276 = vector.broadcast %cst_98 : f32 to vector<2x32xf32>
    %277 = arith.mulf %275, %276 : vector<2x32xf32>
    %cst_99 = arith.constant 0.000000e+00 : f32
    %278 = vector.broadcast %cst_99 : f32 to vector<2x32xf32>
    %279 = arith.cmpf ogt, %277, %278 : vector<2x32xf32>
    %280 = math.exp %277 : vector<2x32xf32>
    %cst_100 = arith.constant 1.000000e+00 : f32
    %281 = vector.broadcast %cst_100 : f32 to vector<2x32xf32>
    %282 = arith.subf %280, %281 : vector<2x32xf32>
    %283 = arith.select %279, %277, %282 : vector<2x32xi1>, vector<2x32xf32>
    %c0_101 = arith.constant 0 : index
    %c0_102 = arith.constant 0 : index
    %c0_103 = arith.constant 0 : index
    %284 = vector.load %arg3[%c0_101, %c0_102, %c0_103] : memref<1x2x16xf32, #tpu.memory_space<vmem>>, vector<1x2x16xf32>
    %285 = vector.shape_cast %284 : vector<1x2x16xf32> to vector<2x16xf32>
    %c0_104 = arith.constant 0 : index
    %c0_105 = arith.constant 0 : index
    %286 = vector.load %arg13[%c0_104, %c0_105] : memref<16x8xf32, #tpu.memory_space<vmem>>, vector<16x8xf32>
    %cst_106 = arith.constant dense<0.000000e+00> : vector<2x8xf32>
    %287 = tpu.matmul %285, %286, %cst_106 {dimension_numbers = #tpu.dot_dimension_numbers<[1], [0], [0], [1], [0, 0, 1, 1], [], []>} : vector<2x16xf32>, vector<16x8xf32>, vector<2x8xf32> -> vector<2x8xf32>
    %288 = vector.extract_strided_slice %0 {offsets = [8, 0], sizes = [1, 8], strides = [1, 1]} : vector<16x128xf32> to vector<1x8xf32>
    %289 = vector.broadcast %288 : vector<1x8xf32> to vector<2x8xf32>
    %290 = arith.addf %287, %289 : vector<2x8xf32>
    %cst_107 = arith.constant 0.000000e+00 : f32
    %291 = vector.broadcast %cst_107 : f32 to vector<2x8xf32>
    %292 = arith.maximumf %290, %291 : vector<2x8xf32>
    %c0_108 = arith.constant 0 : index
    %c0_109 = arith.constant 0 : index
    %293 = vector.load %arg14[%c0_108, %c0_109] : memref<32x64xf32, #tpu.memory_space<vmem>>, vector<32x64xf32>
    %cst_110 = arith.constant dense<0.000000e+00> : vector<2x64xf32>
    %294 = tpu.matmul %283, %293, %cst_110 {dimension_numbers = #tpu.dot_dimension_numbers<[1], [0], [0], [1], [0, 0, 1, 1], [], []>} : vector<2x32xf32>, vector<32x64xf32>, vector<2x64xf32> -> vector<2x64xf32>
    %c0_111 = arith.constant 0 : index
    %c0_112 = arith.constant 0 : index
    %295 = vector.load %arg15[%c0_111, %c0_112] : memref<8x64xf32, #tpu.memory_space<vmem>>, vector<8x64xf32>
    %cst_113 = arith.constant dense<0.000000e+00> : vector<2x64xf32>
    %296 = tpu.matmul %292, %295, %cst_113 {dimension_numbers = #tpu.dot_dimension_numbers<[1], [0], [0], [1], [0, 0, 1, 1], [], []>} : vector<2x8xf32>, vector<8x64xf32>, vector<2x64xf32> -> vector<2x64xf32>
    %297 = arith.addf %294, %296 : vector<2x64xf32>
    %298 = vector.extract_strided_slice %0 {offsets = [9, 0], sizes = [1, 64], strides = [1, 1]} : vector<16x128xf32> to vector<1x64xf32>
    %299 = vector.broadcast %298 : vector<1x64xf32> to vector<2x64xf32>
    %300 = arith.addf %297, %299 : vector<2x64xf32>
    %cst_114 = arith.constant 0.000000e+00 : f32
    %301 = vector.broadcast %cst_114 : f32 to vector<2x64xf32>
    %302 = arith.maximumf %300, %301 : vector<2x64xf32>
    %c0_115 = arith.constant 0 : index
    %c0_116 = arith.constant 0 : index
    %303 = vector.load %arg16[%c0_115, %c0_116] : memref<64x128xf32, #tpu.memory_space<vmem>>, vector<64x128xf32>
    %cst_117 = arith.constant dense<0.000000e+00> : vector<2x128xf32>
    %304 = tpu.matmul %302, %303, %cst_117 {dimension_numbers = #tpu.dot_dimension_numbers<[1], [0], [0], [1], [0, 0, 1, 1], [], []>} : vector<2x64xf32>, vector<64x128xf32>, vector<2x128xf32> -> vector<2x128xf32>
    %305 = vector.extract_strided_slice %0 {offsets = [10, 0], sizes = [1, 128], strides = [1, 1]} : vector<16x128xf32> to vector<1x128xf32>
    %306 = vector.broadcast %305 : vector<1x128xf32> to vector<2x128xf32>
    %307 = arith.addf %304, %306 : vector<2x128xf32>
    %c0_118 = arith.constant 0 : index
    %c0_119 = arith.constant 0 : index
    %c0_120 = arith.constant 0 : index
    %308 = vector.load %arg18[%c0_118, %c0_119, %c0_120] : memref<1x2x128xf32, #tpu.memory_space<vmem>>, vector<1x2x128xf32>
    %309 = vector.shape_cast %308 : vector<1x2x128xf32> to vector<2x128xf32>
    %310 = vector.shape_cast %307 : vector<2x128xf32> to vector<1x2x128xf32>
    tpu.vector_store %arg18[%c0_118, %c0_119, %c0_120], %310 {strides = array<i32>} : memref<1x2x128xf32, #tpu.memory_space<vmem>>, vector<1x2x128xf32>,
    return
  }
  func.func @transform_0(%arg0: i32) -> (i32, i32, i32) {
    %c0_i32 = arith.constant 0 : i32
    %c0_i32_0 = arith.constant 0 : i32
    %c0_i32_1 = arith.constant 0 : i32
    return %arg0, %c0_i32, %c0_i32_0 : i32, i32, i32
  }
  func.func @transform_1(%arg0: i32) -> (i32, i32) {
    %c0_i32 = arith.constant 0 : i32
    %c0_i32_0 = arith.constant 0 : i32
    %c0_i32_1 = arith.constant 0 : i32
    return %c0_i32, %c0_i32_0 : i32, i32
  }
  func.func @transform_2(%arg0: i32) -> (i32, i32, i32) {
    %c0_i32 = arith.constant 0 : i32
    %c0_i32_0 = arith.constant 0 : i32
    %c0_i32_1 = arith.constant 0 : i32
    return %arg0, %c0_i32, %c0_i32_0 : i32, i32, i32
  }
  func.func @transform_3(%arg0: i32) -> (i32, i32, i32) {
    %c0_i32 = arith.constant 0 : i32
    %c0_i32_0 = arith.constant 0 : i32
    %c0_i32_1 = arith.constant 0 : i32
    return %arg0, %c0_i32, %c0_i32_0 : i32, i32, i32
  }
  func.func @transform_4(%arg0: i32) -> (i32, i32) {
    %c0_i32 = arith.constant 0 : i32
    %c0_i32_0 = arith.constant 0 : i32
    %c0_i32_1 = arith.constant 0 : i32
    return %c0_i32, %c0_i32_0 : i32, i32
  }
  func.func @transform_5(%arg0: i32) -> (i32, i32) {
    %c0_i32 = arith.constant 0 : i32
    %c0_i32_0 = arith.constant 0 : i32
    %c0_i32_1 = arith.constant 0 : i32
    return %c0_i32, %c0_i32_0 : i32, i32
  }
  func.func @transform_6(%arg0: i32) -> (i32, i32) {
    %c0_i32 = arith.constant 0 : i32
    %c0_i32_0 = arith.constant 0 : i32
    %c0_i32_1 = arith.constant 0 : i32
    return %c0_i32, %c0_i32_0 : i32, i32
  }
  func.func @transform_7(%arg0: i32) -> (i32, i32) {
    %c0_i32 = arith.constant 0 : i32
    %c0_i32_0 = arith.constant 0 : i32
    %c0_i32_1 = arith.constant 0 : i32
    return %c0_i32, %c0_i32_0 : i32, i32
  }
  func.func @transform_8(%arg0: i32) -> (i32, i32) {
    %c0_i32 = arith.constant 0 : i32
    %c0_i32_0 = arith.constant 0 : i32
    %c0_i32_1 = arith.constant 0 : i32
    return %c0_i32, %c0_i32_0 : i32, i32
  }
  func.func @transform_9(%arg0: i32) -> (i32, i32) {
    %c0_i32 = arith.constant 0 : i32
    %c0_i32_0 = arith.constant 0 : i32
    %c0_i32_1 = arith.constant 0 : i32
    return %c0_i32, %c0_i32_0 : i32, i32
  }
  func.func @transform_10(%arg0: i32) -> (i32, i32, i32) {
    %c0_i32 = arith.constant 0 : i32
    %c0_i32_0 = arith.constant 0 : i32
    %c0_i32_1 = arith.constant 0 : i32
    %c0_i32_2 = arith.constant 0 : i32
    return %c0_i32, %c0_i32_0, %c0_i32_1 : i32, i32, i32
  }
  func.func @transform_11(%arg0: i32) -> (i32, i32, i32) {
    %c0_i32 = arith.constant 0 : i32
    %c0_i32_0 = arith.constant 0 : i32
    %c0_i32_1 = arith.constant 0 : i32
    %c0_i32_2 = arith.constant 0 : i32
    return %c0_i32, %c0_i32_0, %c0_i32_1 : i32, i32, i32
  }
  func.func @transform_12(%arg0: i32) -> (i32, i32) {
    %c0_i32 = arith.constant 0 : i32
    %c0_i32_0 = arith.constant 0 : i32
    %c0_i32_1 = arith.constant 0 : i32
    return %c0_i32, %c0_i32_0 : i32, i32
  }
  func.func @transform_13(%arg0: i32) -> (i32, i32) {
    %c0_i32 = arith.constant 0 : i32
    %c0_i32_0 = arith.constant 0 : i32
    %c0_i32_1 = arith.constant 0 : i32
    return %c0_i32, %c0_i32_0 : i32, i32
  }
  func.func @transform_14(%arg0: i32) -> (i32, i32) {
    %c0_i32 = arith.constant 0 : i32
    %c0_i32_0 = arith.constant 0 : i32
    %c0_i32_1 = arith.constant 0 : i32
    return %c0_i32, %c0_i32_0 : i32, i32
  }
  func.func @transform_15(%arg0: i32) -> (i32, i32) {
    %c0_i32 = arith.constant 0 : i32
    %c0_i32_0 = arith.constant 0 : i32
    %c0_i32_1 = arith.constant 0 : i32
    return %c0_i32, %c0_i32_0 : i32, i32
  }
  func.func @transform_16(%arg0: i32) -> (i32, i32) {
    %c0_i32 = arith.constant 0 : i32
    %c0_i32_0 = arith.constant 0 : i32
    %c0_i32_1 = arith.constant 0 : i32
    return %c0_i32, %c0_i32_0 : i32, i32
  }
  func.func @transform_17(%arg0: i32) -> (i32, i32, i32) {
    %c0_i32 = arith.constant 0 : i32
    %c0_i32_0 = arith.constant 0 : i32
    %c0_i32_1 = arith.constant 0 : i32
    return %arg0, %c0_i32, %c0_i32_0 : i32, i32, i32
  }
}

</mosaic_0001>

<bundles_post_ra>
// kernel: sgtn_forward.1
= control target key start
LH: loop header
LB: loop body
LE: loop exit
PB: predicated region body
PF: predicated region fallthrough
CT: control target
= control target key end

     0   :  { %s2113_s0 = inlined_call_operand.vmem [shape: f32[1,16,3], index: 0, kind: input, shape index: {}]   ;;  %s2114_s1 = inlined_call_operand.vmem [shape: f32[16,32], index: 1, kind: input, shape index: {}]   ;;  %s2115_s2 = inlined_call_operand.vmem [shape: f32[1,2,16], index: 2, kind: input, shape index: {}]   ;;  %s2116_s3 = inlined_call_operand.vmem [shape: f32[1,2,2], index: 3, kind: input, shape index: {}]   ;;  %s2117_s4 = inlined_call_operand.hbm [shape: f32[16,16], index: 4, kind: input, shape index: {}]   ;;  %s2118_s5 = inlined_call_operand.hbm [shape: f32[2,16], index: 5, kind: input, shape index: {}]   ;;  %s2119_s6 = inlined_call_operand.hbm [shape: f32[3,32], index: 6, kind: input, shape index: {}]   ;;  %s2120_s7 = inlined_call_operand.vmem [shape: f32[32,192], index: 7, kind: input, shape index: {}]   ;;  %s2121_s8 = inlined_call_operand.vmem [shape: f32[32,64], index: 8, kind: input, shape index: {}]   ;;  %s2122_s9 = inlined_call_operand.vmem [shape: f32[64,32], index: 9, kind: input, shape index: {}]   ;;  %s2123_s10 = inlined_call_operand.hbm [shape: f32[2,32,66], index: 10, kind: input, shape index: {}]   ;;  %s2124_s11 = inlined_call_operand.hbm [shape: f32[2,2,32], index: 11, kind: input, shape index: {}]   ;;  %s2125_s12 = inlined_call_operand.vmem [shape: f32[16,8], index: 12, kind: input, shape index: {}]   ;;  %s2126_s13 = inlined_call_operand.hbm [shape: f32[32,64], index: 13, kind: input, shape index: {}]   ;;  %s2127_s14 = inlined_call_operand.vmem [shape: f32[8,64], index: 14, kind: input, shape index: {}]   ;;  %s2128_s15 = inlined_call_operand.hbm [shape: f32[64,128], index: 15, kind: input, shape index: {}]   ;;  %s2129_s16 = inlined_call_operand.hbm [shape: f32[16,128], index: 16, kind: input, shape index: {}]   ;;  %s2130_s17 = inlined_call_operand.vmem [shape: f32[1,2,128], index: 17, kind: output, shape index: {}]  }
   0x1   :  { %2133 = sst [smem:[#allocation20_spill]] %s2113_s0 }
   0x2   :  { %2134 = sst [smem:[#allocation21_spill]] %s2114_s1 }
   0x3   :  { %22 = vsyncpa [#allocation3], 0 }
   0x4   :  { %23 = vsyncpa [#allocation5], 0 }
   0x5   :  { %24 = vsyncpa [#allocation8], 0 }
   0x6   :  { %25 = vsyncpa [#allocation11], 0  ;;  %s53_s26 = sshll.u32 %s2118_s5, 4  ;;  %s54_s26 = int_to_ptr.hbm [resolvable:$true] %s53_s26 }
   0x7   :  { %26 = vsyncpa [#allocation14], 0  ;;  %s1683_s27 = smov [#allocation4]   ;;  %s80_s30 = sshll.u32 %s2123_s10, 4  ;;  %s81_s30 = int_to_ptr.hbm [resolvable:$true] %s80_s30 }
   0x8   :  { %s55_s28 = sshll.u32 %s1683_s27, 4  ;;  %s1684_s18 = smov [#allocation7]   ;;  %s56_s28 = int_to_ptr.vmem [resolvable:$true] %s55_s28 }
   0x9   :  { %58 = dma.hbm_to_vmem [thread:$0]  %s54_s26, 32, %s56_s28, [#allocation5]  }
   0xa   :  { %s82_s19 = sshll.u32 %s1684_s18, 4  ;;  %s108_s21 = sshll.u32 %s2126_s13, 4  ;;  %s83_s19 = int_to_ptr.vmem [resolvable:$true] %s82_s19  ;;  %s109_s21 = int_to_ptr.hbm [resolvable:$true] %s108_s21 }
   0xb   :  { %s1685_s5 = smov 128   ;;  %s1686_s22 = smov 8  }
   0xc   :  { %88 = dma.hbm_to_vmem [thread:$0]  %s81_s30, 1024, %s83_s19, [#allocation8], %s1685_s5, %s1685_s5, %s1686_s22  }
   0xd   :  { %s39_s25 = sshll.u32 %s2117_s4, 4  ;;  %s1687_s10 = smov [#allocation10]   ;;  %s40_s25 = int_to_ptr.hbm [resolvable:$true] %s39_s25 }
   0xe   :  { %s110_s26 = sshll.u32 %s1687_s10, 4  ;;  %s1688_s13 = smov [#allocation2]   ;;  %s111_s26 = int_to_ptr.vmem [resolvable:$true] %s110_s26 }
   0xf   :  { %116 = dma.hbm_to_vmem [thread:$0]  %s109_s21, 512, %s111_s26, [#allocation11], %s1685_s5, %s1685_s5, %s1686_s22  }
  0x10   :  { %s41_s27 = sshll.u32 %s1688_s13, 4  ;;  %s64_s0 = sshll.u32 %s2119_s6, 4  ;;  %s42_s27 = int_to_ptr.vmem [resolvable:$true] %s41_s27  ;;  %s65_s0 = int_to_ptr.hbm [resolvable:$true] %s64_s0 }
  0x11   :  { %47 = dma.hbm_to_vmem [thread:$0]  %s40_s25, 256, %s42_s27, [#allocation3], %s1685_s5, %s1685_s5, %s1686_s22  }
  0x12   :  { %s93_s18 = sshll.u32 %s2124_s11, 4  ;;  %s1689_s19 = smov [#allocation6]   ;;  %s94_s18 = int_to_ptr.hbm [resolvable:$true] %s93_s18 }
  0x13   :  { %s66_s1 = sshll.u32 %s1689_s19, 4  ;;  %s1690_s20 = smov [#allocation9]   ;;  %s67_s1 = int_to_ptr.vmem [resolvable:$true] %s66_s1 }
  0x14   :  { %69 = dma.hbm_to_vmem [thread:$0]  %s65_s0, 64, %s67_s1, [#allocation5]  }
  0x15   :  { %s95_s21 = sshll.u32 %s1690_s20, 4  ;;  %s1691_s23 = smov 32   ;;  %s96_s21 = int_to_ptr.vmem [resolvable:$true] %s95_s21 }
  0x16   :  { %s1692_s6 = smov 2   ;;  %s123_s25 = sshll.u32 %s2128_s15, 4  ;;  %s124_s25 = int_to_ptr.hbm [resolvable:$true] %s123_s25 }
  0x17   :  { %101 = dma.hbm_to_vmem [thread:$0]  %s94_s18, 64, %s96_s21, [#allocation8], %s1691_s23, %s1691_s23, %s1692_s6  }
  0x18   :  { %s1693_s26 = smov [#allocation12]   ;;  %s136_s28 = sshll.u32 %s2129_s16, 4  ;;  %s137_s28 = int_to_ptr.hbm [resolvable:$true] %s136_s28 }
  0x19   :  { %s125_s11 = sshll.u32 %s1693_s26, 4  ;;  %s1694_s29 = smov [#allocation13]   ;;  %s126_s11 = int_to_ptr.vmem [resolvable:$true] %s125_s11 }
  0x1a   :  { %131 = dma.hbm_to_vmem [thread:$0]  %s124_s25, 1024, %s126_s11, [#allocation11], %s1685_s5, %s1685_s5, %s1686_s22  }
  0x1b   :  { %s138_s0 = sshll.u32 %s1694_s29, 4  ;;  %s139_s0 = int_to_ptr.vmem [resolvable:$true] %s138_s0 }
  0x1c   :  { %144 = dma.hbm_to_vmem [thread:$0]  %s137_s28, 256, %s139_s0, [#allocation14], %s1685_s5, %s1685_s5, %s1686_s22  }
  0x1d   :  { %1673 = dma.done.wait [#allocation3], 256  }
  0x1e   :  { %1674 = vsyncadd [#allocation3], 4294967040 }
  0x1f   :  { %1675 = dma.done.wait [#allocation5], 96  }
  0x20   :  { %1676 = vsyncadd [#allocation5], 4294967200 }
  0x21   :  { %1677 = dma.done.wait [#allocation8], 1088  }
  0x22   :  { %1678 = vsyncadd [#allocation8], 4294966208 }
  0x23   :  { %1679 = dma.done.wait [#allocation11], 1536  }
  0x24   :  { %1680 = vsyncadd [#allocation11], 4294965760 }
  0x25   :  { %1681 = dma.done.wait [#allocation14], 256  }
  0x26   :  { %1682 = vsyncadd [#allocation14], 4294967040  ;;  %vm191_vm0 = vcmask 1042432   ;;  %vm184_vm1 = vcmask 23552   ;;  %v181_v0 = vld [vmem:[#allocation6] sm:$0x7] }
  0x27   :  { %s2135_s4 = sld [smem:[#allocation20_spill]]  ;;  %1316 = vmatpush.msk.msra.mxu0 %vm191_vm0, %v181_v0  ;;  %v224_v2 = vld [vmem:[%s2120_s7 + $0x30] sm:$0xff]  ;;  %v225_v3 = vld [vmem:[%s2120_s7 + $0x38] sm:$0xff]  ;;  %v222_v4 = vld [vmem:[%s2120_s7 + $0x20] sm:$0xff]  ;;  %vm226_vm2 = vcmask 261120   ;;  %s1695_s30 = smov 96  }
  0x28   :  { %245 = vmatpush.msra.mxu1 %v224_v2  ;;  %v223_v5 = vld [vmem:[%s2120_s7 + $0x28] sm:$0xff]  ;;  %268 = vmatpush.msra.mxu2 %v225_v3  ;;  %v220_v7 = vld [vmem:[%s2120_s7 + $0x10] sm:$0xff]  ;;  %v221_v8 = vld [vmem:[%s2120_s7 + $0x18] sm:$0xff]  ;;  %s2136_s16 = sld [smem:[#allocation21_spill]]  ;;  %s1696_s5 = smov 120   ;;  %vm290_vm3 = vcmask 64512  }
  0x29   :  { %1372 = vmatpush.msra.mxu3 %v225_v3  ;;  %v218_v9 = vld [vmem:[%s2120_s7] sm:$0xff]  ;;  %v219_v10 = vld [vmem:[%s2120_s7 + $0x8] sm:$0xff]  ;;  %s1697_s22 = smov 88   ;;  %vm322_vm4 = vcmask 130048   ;;  %s1698_s18 = smov 80   ;;  %vm775_vm12 = vcmask 523264  }
  0x2a   :  { %246 = vmatpush.msra.mxu1 %v222_v4  ;;  %269 = vmatpush.msra.mxu2 %v223_v5  ;;  %v1887_v18 = vld [vmem:[#allocation13] sm:$0xff]  ;;  %v1920_v39 = vld [vmem:[#allocation2 + $0x8] sm:$0xff]  ;;  %s1699_s19 = smov 72   ;;  %s1700_s1 = smov 112  }
  0x2b   :  { %1373 = vmatpush.msra.mxu3 %v223_v5  ;;  %v279_v19 = vperm.slane %v1887_v18, 0  ;;  %v1916_v35 = vld [vmem:[#allocation2] sm:$0xff]  ;;  %s1701_s20 = smov 104   ;;  %s1702_s21 = smov 64  }
  0x2c   :  { %247 = vmatpush.msra.mxu1 %v220_v7  ;;  %270 = vmatpush.msra.mxu2 %v221_v8 }
  0x2d   :  { %v179_v1 = vld [vmem:[%s2135_s4] sm:$0xff]  ;;  %v180_v6 = vld [vmem:[%s2135_s4 + $0x8] sm:$0xff]  ;;  %1374 = vmatpush.msra.mxu3 %v221_v8 }
  0x2e   :  { %1317 = vmatmul.msk.f32.vlgmr.msra.gmra.mxu0 %vm184_vm1, %v179_v1  ;;  %248 = vmatpush.msra.mxu1 %v218_v9  ;;  %v182_v11 = vld [vmem:[%s2136_s16] sm:$0xff]  ;;  %v183_v14 = vld [vmem:[%s2136_s16 + $0x8] sm:$0xff] }
  0x2f   :  { %271 = vmatpush.msra.mxu2 %v219_v10  ;;  %1375 = vmatpush.msra.mxu3 %v219_v10 }
  0x36   :  { %1318 = vmatmul.msk.f32.gmra.mxu0 %vm184_vm1, %v180_v6 }
  0xab   :  { %v212_v12 = vpop.f32.mrf.mxu0 }
  0xac   :  { %v1872_v13 = vadd.f32 %v212_v12, %v182_v11 }
  0xae   :  { %1319 = vmatmul.msk.f32.vlgmr.msra.gmra.mxu1 %vm226_vm2, %v1872_v13  ;;  %1321 = vmatmul.msk.f32.vlgmr.msra.gmra.mxu2 %vm226_vm2, %v1872_v13 }
  0xb3   :  { %v215_v15 = vpop.f32.mrf.mxu0 }
  0xb4   :  { %v1881_v16 = vadd.f32 %v215_v15, %v183_v14 }
  0xb6   :  { %1320 = vmatmul.msk.f32.gmra.mxu1 %vm226_vm2, %v1881_v16  ;;  %1322 = vmatmul.msk.f32.vlgmr.msra.gmra.mxu3 %vm226_vm2, %v1881_v16 }
 0x12b   :  { %v250_v17 = vpop.f32.mrf.mxu1 }
 0x131   :  { %v273_v20 = vpop.f32.mrf.mxu2 }
 0x132   :  { %v1890_v21 = vadd.f32 %v279_v19, %v273_v20 }
 0x133   :  { %v253_v22 = vpop.f32.mrf.mxu1 }
 0x134   :  { %463 = vmatpush.msrb.mxu2 %v253_v22  ;;  %286 = vrot.lane.b32.xlu2 %v1890_v21, %s1695_s30  ;;  %v1900_v25 = vpack.i.bf16 %v250_v17, %v253_v22 }
 0x135   :  { %345 = vrot.lane.b32.xlu1 %v1890_v21, %s1696_s5 }
 0x136   :  { %464 = vmatpush.msrb.mxu2 %v250_v17 }
 0x139   :  { %v276_v23 = vpop.f32.mrf.mxu3 }
 0x13a   :  { %v1895_v24 = vadd.f32 %v279_v19, %v276_v23 }
 0x13c   :  { %351 = vrot.lane.b32.xlu0 %v1895_v24, %s1697_s22 }
 0x13d   :  { %347 = vrot.lane.b32.xlu1 %v1895_v24, %s1696_s5 }
 0x144   :  { %349 = vrot.lane.b32.xlu0 %v1890_v21, %s1697_s22 }
 0x14c   :  { %1400 = vrot.lane.b32.xlu0 %v1900_v25, %s1695_s30 }
 0x154   :  { %288 = vrot.lane.b32.xlu0 %v1895_v24, %s1695_s30 }
 0x18e   :  { %v287_v34 = vpop.permute.xlu2 %286 }
 0x1a7   :  { %v346_v28 = vpop.permute.xlu1 %345 }
 0x1ae   :  { %v352_v26 = vpop.permute.xlu0 %351 }
 0x1af   :  { %1327 = vmatpush.xpose.msk.msrb.mxu0 %vm290_vm3, %v352_v26  ;;  %v348_v31 = vpop.permute.xlu1 %347 }
 0x1b6   :  { %v350_v27 = vpop.permute.xlu0 %349 }
 0x1b7   :  { %1328 = vmatpush.xpose.msk.msrb.mxu0 %vm290_vm3, %v350_v27 }
 0x1ba   :  { %1329 = vmatmul.msk.f32.vlgmr.msrb.gmra.mxu0 %vm290_vm3, %v346_v28 }
 0x1be   :  { %v1401_v29 = vpop.permute.xlu0 %1400 }
 0x1bf   :  { %v1402_v30 = vunpack.i.l.bf16 %v1401_v29  ;;  %v1403_v32 = vunpack.i.h.bf16 %v1401_v29 }
 0x1c1   :  { %434 = vmatpush.msrb.mxu1 %v1402_v30 }
 0x1c2   :  { %1330 = vmatmul.msk.f32.gmra.mxu0 %vm290_vm3, %v348_v31 }
 0x1c3   :  { %435 = vmatpush.msrb.mxu1 %v1403_v32 }
 0x1c6   :  { %v289_v33 = vpop.permute.xlu0 %288 }
 0x1c7   :  { %1323 = vmatpush.xpose.msk.msrb.mxu3 %vm290_vm3, %v289_v33 }
 0x1cb   :  { %1324 = vmatpush.xpose.msk.msrb.mxu3 %vm290_vm3, %v287_v34 }
 0x1ce   :  { %1325 = vmatmul.msk.f32.vlgmr.msrb.gmra.mxu3 %vm290_vm3, %v1890_v21 }
 0x1d6   :  { %1326 = vmatmul.msk.f32.gmra.mxu3 %vm290_vm3, %v1895_v24 }
 0x237   :  { %v378_v36 = vpop.f32.mrf.mxu0 }
 0x238   :  { %v379_v37 = vadd.f32 %v378_v36, %v1916_v35 }
 0x23a   :  { %v384_v38 = vsel %vm322_vm4, %v379_v37, -inf }
 0x23b   :  { %385 = vmax.xlane.f32.xlu2 %v384_v38 }
 0x23f   :  { %v381_v40 = vpop.f32.mrf.mxu0 }
 0x240   :  { %v382_v41 = vadd.f32 %v381_v40, %v1920_v39 }
 0x242   :  { %v387_v42 = vsel %vm322_vm4, %v382_v41, -inf }
 0x243   :  { %388 = vmax.xlane.f32.xlu2 %v387_v42 }
 0x251   :  { %v316_v43 = vpop.f32.mrf.mxu3 }
 0x252   :  { %v317_v61 = vadd.f32 %v316_v43, %v1916_v35 }
 0x254   :  { %v323_v62 = vsel %vm322_vm4, %v317_v61, -inf }
 0x259   :  { %v319_v44 = vpop.f32.mrf.mxu3 }
 0x25a   :  { %v1933_v45 = vadd.f32 %v319_v44, %v1920_v39 }
 0x25b   :  { %478 = vrot.lane.b32.xlu2 %v1895_v24, %s1698_s18 }
 0x25c   :  { %v326_v46 = vsel %vm322_vm4, %v1933_v45, -inf }
 0x263   :  { %576 = vrot.lane.b32.xlu2 %v1895_v24, %s1699_s19 }
 0x26b   :  { %476 = vrot.lane.b32.xlu2 %v1890_v21, %s1698_s18 }
 0x273   :  { %472 = vrot.lane.b32.xlu2 %v1890_v21, %s1700_s1 }
 0x27b   :  { %570 = vrot.lane.b32.xlu2 %v1890_v21, %s1701_s20 }
 0x283   :  { %572 = vrot.lane.b32.xlu2 %v1895_v24, %s1701_s20 }
 0x2ac   :  { %327 = vmax.xlane.f32.xlu2 %v326_v46 }
 0x2ae   :  { %v386_v47 = vpop.xlane.xlu2 %385 }
 0x2af   :  { %v390_v48 = vsub.f32 %v379_v37, %v386_v47 }
 0x2b1   :  { %v392_v49 = vmul.f32 1.442695, %v390_v48 }
 0x2b3   :  { %1419 = vpow2.f32 %v392_v49 }
 0x2b6   :  { %v389_v50 = vpop.xlane.xlu2 %388 }
 0x2b7   :  { %v391_v51 = vsub.f32 %v382_v41, %v389_v50 }
 0x2b9   :  { %v1420_v52 = vpop.eup %1419  ;;  %v394_v53 = vmul.f32 1.442695, %v391_v51 }
 0x2ba   :  { %v396_v54 = vsel %vm322_vm4, %v1420_v52, 0.0 }
 0x2bb   :  { %1421 = vpow2.f32 %v394_v53  ;;  %397 = vadd.xlane.f32.xlu1 %v396_v54 }
 0x2be   :  { %v479_v55 = vpop.permute.xlu2 %478 }
 0x2bf   :  { %1335 = vmatpush.xpose.msk.msra.mxu3 %vm290_vm3, %v479_v55 }
 0x2c1   :  { %v1422_v56 = vpop.eup %1421 }
 0x2c2   :  { %v399_v57 = vsel %vm322_vm4, %v1422_v56, 0.0 }
 0x2c3   :  { %400 = vadd.xlane.f32.xlu0 %v399_v57 }
 0x2c6   :  { %v577_v58 = vpop.permute.xlu2 %576 }
 0x2c7   :  { %1341 = vmatpush.xpose.msk.msra.mxu1 %vm290_vm3, %v577_v58 }
 0x2ce   :  { %v477_v59 = vpop.permute.xlu2 %476 }
 0x2cf   :  { %1336 = vmatpush.xpose.msk.msra.mxu3 %vm290_vm3, %v477_v59 }
 0x2d4   :  { %574 = vrot.lane.b32.xlu1 %v1890_v21, %s1699_s19 }
 0x2d6   :  { %v473_v60 = vpop.permute.xlu2 %472 }
 0x2d7   :  { %474 = vrot.lane.b32.xlu0 %v1895_v24, %s1700_s1  ;;  %1337 = vmatmul.msk.f32.vlgmr.msra.gmra.mxu3 %vm290_vm3, %v473_v60 }
 0x2de   :  { %v571_v6 = vpop.permute.xlu2 %570 }
 0x2e6   :  { %v573_v8 = vpop.permute.xlu2 %572 }
 0x2fe   :  { %324 = vmax.xlane.f32.xlu1 %v323_v62 }
 0x31f   :  { %v328_v20 = vpop.xlane.xlu2 %327 }
 0x320   :  { %v330_v23 = vsub.f32 %v1933_v45, %v328_v20 }
 0x322   :  { %v333_v26 = vmul.f32 1.442695, %v330_v23 }
 0x32e   :  { %v398_v63 = vpop.xlane.xlu1 %397 }
 0x32f   :  { %1423 = vrcp.f32 %v398_v63 }
 0x335   :  { %v1424_v0 = vpop.eup %1423 }
 0x336   :  { %v401_v1 = vpop.xlane.xlu0 %400  ;;  %v404_v2 = vmul.f32 %v1424_v0, %v1420_v52 }
 0x337   :  { %1425 = vrcp.f32 %v401_v1 }
 0x338   :  { %1331 = vmatmul.msk.f32.vlgmr.msrb.gmra.mxu1 %vm322_vm4, %v404_v2 }
 0x33d   :  { %v1426_v3 = vpop.eup %1425 }
 0x33e   :  { %v405_v4 = vmul.f32 %v1426_v3, %v1422_v56 }
 0x340   :  { %1332 = vmatmul.msk.f32.gmra.mxu1 %vm322_vm4, %v405_v4 }
 0x346   :  { %v575_v5 = vpop.permute.xlu1 %574 }
 0x347   :  { %1342 = vmatpush.xpose.msk.msra.mxu1 %vm290_vm3, %v575_v5 }
 0x349   :  { %v475_v7 = vpop.permute.xlu0 %474 }
 0x34a   :  { %1338 = vmatmul.msk.f32.gmra.mxu3 %vm290_vm3, %v475_v7  ;;  %1343 = vmatmul.msk.f32.vlgmr.msra.gmra.mxu1 %vm290_vm3, %v571_v6 }
 0x352   :  { %1344 = vmatmul.msk.f32.gmra.mxu1 %vm290_vm3, %v573_v8 }
 0x35a   :  { %v505_v9 = vpop.f32.mrf.mxu3 }
 0x35b   :  { %v506_v10 = vadd.f32 %v505_v9, %v1916_v35 }
 0x35d   :  { %v511_v11 = vsel %vm322_vm4, %v506_v10, -inf }
 0x35e   :  { %512 = vmax.xlane.f32.xlu1 %v511_v11 }
 0x371   :  { %v325_v14 = vpop.xlane.xlu1 %324 }
 0x372   :  { %v329_v17 = vsub.f32 %v317_v61, %v325_v14 }
 0x374   :  { %v331_v19 = vmul.f32 1.442695, %v329_v17 }
 0x376   :  { %1427 = vpow2.f32 %v331_v19 }
 0x377   :  { %1429 = vpow2.f32 %v333_v26 }
 0x37c   :  { %v1428_v29 = vpop.eup %1427 }
 0x37d   :  { %v335_v36 = vsel %vm322_vm4, %v1428_v29, 0.0  ;;  %v1430_v38 = vpop.eup %1429 }
 0x37e   :  { %v338_v40 = vsel %vm322_vm4, %v1430_v38, 0.0 }
 0x3b5   :  { %v1957_v12 = vpop.f32.mrf.mxu1 }
 0x3bd   :  { %v1959_v15 = vpop.f32.mrf.mxu1 }
 0x3c7   :  { %v603_v21 = vpop.f32.mrf.mxu1 }
 0x3c8   :  { %v604_v22 = vadd.f32 %v603_v21, %v1916_v35 }
 0x3ca   :  { %v609_v24 = vsel %vm322_vm4, %v604_v22, -inf }
 0x3cb   :  { %610 = vmax.xlane.f32.xlu0 %v609_v24 }
 0x3cd   :  { %v508_v27 = vpop.f32.mrf.mxu3 }
 0x3ce   :  { %v509_v28 = vadd.f32 %v508_v27, %v1920_v39  ;;  %v668_v27 = vperm.slane %v1887_v18, 1 }
 0x3cf   :  { %v606_v30 = vpop.f32.mrf.mxu1 }
 0x3d0   :  { %v607_v31 = vadd.f32 %v606_v30, %v1920_v39  ;;  %v514_v32 = vsel %vm322_vm4, %v509_v28, -inf }
 0x3d1   :  { %v513_v33 = vpop.xlane.xlu1 %512  ;;  %515 = vmax.xlane.f32.xlu1 %v514_v32 }
 0x3d2   :  { %v517_v34 = vsub.f32 %v506_v10, %v513_v33  ;;  %v612_v35 = vsel %vm322_vm4, %v607_v31, -inf }
 0x3d3   :  { %613 = vmax.xlane.f32.xlu2 %v612_v35  ;;  %336 = vadd.xlane.f32.xlu0 %v335_v36 }
 0x3d4   :  { %v519_v37 = vmul.f32 1.442695, %v517_v34 }
 0x3d6   :  { %1431 = vpow2.f32 %v519_v37 }
 0x3db   :  { %339 = vadd.xlane.f32.xlu2 %v338_v40 }
 0x3dc   :  { %v1432_v41 = vpop.eup %1431 }
 0x3dd   :  { %v523_v39 = vsel %vm322_vm4, %v1432_v41, 0.0 }
 0x3de   :  { %524 = vadd.xlane.f32.xlu0 %v523_v39 }
 0x3f2   :  { %1410 = vrot.lane.b32.xlu0 %v1900_v25, %s1702_s21 }
 0x3f3   :  { %1405 = vrot.lane.b32.xlu2 %v1900_v25, %s1691_s23 }
 0x43e   :  { %v611_v42 = vpop.xlane.xlu0 %610 }
 0x43f   :  { %v615_v43 = vsub.f32 %v604_v22, %v611_v42 }
 0x441   :  { %v617_v44 = vmul.f32 1.442695, %v615_v43 }
 0x443   :  { %1433 = vpow2.f32 %v617_v44 }
 0x444   :  { %v516_v45 = vpop.xlane.xlu1 %515 }
 0x445   :  { %v518_v50 = vsub.f32 %v509_v28, %v516_v45 }
 0x446   :  { %v614_v46 = vpop.xlane.xlu2 %613  ;;  %v337_v47 = vpop.xlane.xlu0 %336 }
 0x447   :  { %v616_v48 = vsub.f32 %v607_v31, %v614_v46  ;;  %1435 = vrcp.f32 %v337_v47  ;;  %v521_v54 = vmul.f32 1.442695, %v518_v50 }
 0x449   :  { %v1434_v49 = vpop.eup %1433  ;;  %v619_v51 = vmul.f32 1.442695, %v616_v48 }
 0x44a   :  { %v621_v52 = vsel %vm322_vm4, %v1434_v49, 0.0 }
 0x44b   :  { %1437 = vpow2.f32 %v619_v51  ;;  %622 = vadd.xlane.f32.xlu1 %v621_v52 }
 0x44d   :  { %v1436_v53 = vpop.eup %1435 }
 0x44e   :  { %v340_v55 = vpop.xlane.xlu2 %339  ;;  %v343_v25 = vmul.f32 %v1436_v53, %v1428_v29 }
 0x44f   :  { %1439 = vrcp.f32 %v340_v55  ;;  %v732_v55 = vld [vmem:[%s2121_s8 + $0x10] sm:$0xff] }
 0x450   :  { %1333 = vmatmul.msk.f32.vlgmr.msrb.gmra.mxu2 %vm322_vm4, %v343_v25  ;;  %1441 = vpow2.f32 %v521_v54  ;;  %v733_v54 = vld [vmem:[%s2121_s8 + $0x18] sm:$0xff]  ;;  %v731_v25 = vld [vmem:[%s2121_s8 + $0x8] sm:$0xff] }
 0x451   :  { %v1438_v56 = vpop.eup %1437  ;;  %v525_v1 = vpop.xlane.xlu0 %524  ;;  %753 = vmatpush.msrb.mxu3 %v733_v54 }
 0x452   :  { %v624_v57 = vsel %vm322_vm4, %v1438_v56, 0.0  ;;  %1443 = vrcp.f32 %v525_v1 }
 0x453   :  { %625 = vadd.xlane.f32.xlu1 %v624_v57  ;;  %754 = vmatpush.msrb.mxu3 %v732_v55 }
 0x455   :  { %v1440_v58 = vpop.eup %1439  ;;  %755 = vmatpush.msrb.mxu3 %v731_v25 }
 0x456   :  { %v1406_v59 = vpop.permute.xlu2 %1405  ;;  %v344_v60 = vmul.f32 %v1440_v58, %v1430_v38  ;;  %v1442_v61 = vpop.eup %1441 }
 0x457   :  { %v1407_v62 = vunpack.i.l.bf16 %v1406_v59  ;;  %v1408_v63 = vunpack.i.h.bf16 %v1406_v59  ;;  %v526_v0 = vsel %vm322_vm4, %v1442_v61, 0.0 }
 0x458   :  { %1334 = vmatmul.msk.f32.gmra.mxu2 %vm322_vm4, %v344_v60  ;;  %v1444_v3 = vpop.eup %1443  ;;  %v773_v60 = vld [vmem:[%s2122_s9 + $0x38] sm:$0xff] }
 0x459   :  { %657 = vmatpush.msra.mxu2 %v1407_v62  ;;  %v531_v6 = vmul.f32 %v1444_v3, %v1432_v41  ;;  %v1703_v41 = vmov 32.0   ;;  %v770_v3 = vld [vmem:[%s2122_s9 + $0x20] sm:$0xff] }
 0x45b   :  { %658 = vmatpush.msra.mxu2 %v1408_v63  ;;  %527 = vadd.xlane.f32.xlu1 %v526_v0  ;;  %v771_v63 = vld [vmem:[%s2122_s9 + $0x28] sm:$0xff] }
 0x464   :  { %v1411_v2 = vpop.permute.xlu0 %1410 }
 0x465   :  { %v1412_v4 = vunpack.i.l.bf16 %v1411_v2  ;;  %v1413_v5 = vunpack.i.h.bf16 %v1411_v2 }
 0x467   :  { %559 = vmatpush.msra.mxu0 %v1412_v4 }
 0x469   :  { %560 = vmatpush.msra.mxu0 %v1413_v5 }
 0x46a   :  { %1339 = vmatmul.msk.f32.vlgmr.msra.gmra.mxu0 %vm322_vm4, %v531_v6  ;;  %v769_v6 = vld [vmem:[%s2122_s9 + $0x18] sm:$0xff] }
 0x46b   :  { %790 = vmatpush.msrb.mxu0 %v773_v60  ;;  %v885_v60 = vld [vmem:[#allocation7 + $0x18] sm:$0xff] }
 0x46c   :  { %902 = vmatpush.msrb.mxu2 %v885_v60 }
 0x4be   :  { %v623_v7 = vpop.xlane.xlu1 %622 }
 0x4bf   :  { %1445 = vrcp.f32 %v623_v7 }
 0x4c5   :  { %v1446_v8 = vpop.eup %1445 }
 0x4c6   :  { %v629_v9 = vmul.f32 %v1446_v8, %v1434_v49  ;;  %v626_v10 = vpop.xlane.xlu1 %625 }
 0x4c7   :  { %1447 = vrcp.f32 %v626_v10  ;;  %v724_v10 = vperm.slane %v1887_v18, 2 }
 0x4c8   :  { %1345 = vmatmul.msk.f32.vlgmr.msra.gmra.mxu2 %vm322_vm4, %v629_v9 }
 0x4cd   :  { %v1448_v11 = vpop.eup %1447 }
 0x4ce   :  { %v528_v14 = vpop.xlane.xlu1 %527  ;;  %v630_v17 = vmul.f32 %v1448_v11, %v1438_v56  ;;  %v730_v56 = vld [vmem:[%s2121_s8] sm:$0xff] }
 0x4cf   :  { %1449 = vrcp.f32 %v528_v14  ;;  %756 = vmatpush.msrb.mxu3 %v730_v56 }
 0x4d0   :  { %1346 = vmatmul.msk.f32.gmra.mxu2 %vm322_vm4, %v630_v17  ;;  %1451 = vrcp.f32 %v1703_v41 }
 0x4d3   :  { %v466_v21 = vpop.f32.mrf.mxu2 }
 0x4d4   :  { %v467_v24 = vadd.f32 %v466_v21, %v1957_v12 }
 0x4d5   :  { %v1450_v19 = vpop.eup %1449 }
 0x4d6   :  { %v532_v20 = vmul.f32 %v1450_v19, %v1442_v61  ;;  %v1452_v39 = vpop.eup %1451  ;;  %v772_v61 = vld [vmem:[%s2122_s9 + $0x30] sm:$0xff]  ;;  %v727_v19 = vperm.slane %v1887_v18, 3 }
 0x4d7   :  { %v680_v42 = vmul.f32 32.0, %v1452_v39  ;;  %vm684_vm5 = vweird.f32 %v1452_v39  ;;  %791 = vmatpush.msrb.mxu0 %v772_v61  ;;  %v884_v61 = vld [vmem:[#allocation7 + $0x10] sm:$0xff] }
 0x4d8   :  { %1340 = vmatmul.msk.f32.gmra.mxu0 %vm322_vm4, %v532_v20  ;;  %903 = vmatpush.msrb.mxu2 %v884_v61 }
 0x4d9   :  { %792 = vmatpush.msrb.mxu0 %v771_v63  ;;  %v883_v63 = vld [vmem:[#allocation7 + $0x8] sm:$0xff] }
 0x4da   :  { %904 = vmatpush.msrb.mxu2 %v883_v63 }
 0x4db   :  { %v469_v22 = vpop.f32.mrf.mxu2  ;;  %793 = vmatpush.msrb.mxu0 %v770_v3 }
 0x4dc   :  { %v470_v33 = vadd.f32 %v469_v22, %v1959_v15 }
 0x4dd   :  { %794 = vmatpush.msrb.mxu0 %v769_v6 }
 0x4e7   :  { %v562_v23 = vpop.f32.mrf.mxu0 }
 0x4e8   :  { %v568_v26 = vadd.f32 %v562_v23, %v467_v24 }
 0x54b   :  { %v660_v28 = vpop.f32.mrf.mxu2 }
 0x54c   :  { %v666_v29 = vadd.f32 %v660_v28, %v568_v26 }
 0x54e   :  { %v669_v30 = vadd.f32 %v668_v27, %v666_v29 }
 0x550   :  { %v671_v31 = vadd.f32 %v669_v30, %v1872_v13  ;;  %v681_v13 = vsub.f32 1.0, %v680_v42  ;;  %v774_v42 = vperm.slane %v1887_v18, 5 }
 0x552   :  { %v673_v32 = vsel %vm226_vm2, %v671_v31, 0.0  ;;  %v682_v43 = vmul.f32 %v1452_v39, %v681_v13 }
 0x553   :  { %674 = vadd.xlane.f32.xlu1 %v673_v32  ;;  %v663_v36 = vpop.f32.mrf.mxu2  ;;  %v768_v32 = vld [vmem:[%s2122_s9 + $0x10] sm:$0xff] }
 0x554   :  { %v683_v44 = vadd.f32 %v1452_v39, %v682_v43  ;;  %795 = vmatpush.msrb.mxu0 %v768_v32 }
 0x555   :  { %v565_v34 = vpop.f32.mrf.mxu0 }
 0x556   :  { %v569_v35 = vadd.f32 %v565_v34, %v470_v33  ;;  %v1990_v45 = vsel %vm684_vm5, %v1452_v39, %v683_v44  ;;  %v767_v33 = vld [vmem:[%s2122_s9 + $0x8] sm:$0xff]  ;;  %v766_v34 = vld [vmem:[%s2122_s9] sm:$0xff] }
 0x557   :  { %796 = vmatpush.msrb.mxu0 %v767_v33  ;;  %v886_v33 = vld [vmem:[#allocation9] sm:$0x3] }
 0x558   :  { %v667_v37 = vadd.f32 %v663_v36, %v569_v35  ;;  %v734_v35 = vperm.slane %v1887_v18, 4 }
 0x559   :  { %797 = vmatpush.msrb.mxu0 %v766_v34 }
 0x55a   :  { %v670_v38 = vadd.f32 %v668_v27, %v667_v37 }
 0x55c   :  { %v672_v12 = vadd.f32 %v670_v38, %v1881_v16 }
 0x55e   :  { %v676_v40 = vsel %vm226_vm2, %v672_v12, 0.0 }
 0x55f   :  { %677 = vadd.xlane.f32.xlu2 %v676_v40 }
 0x5c6   :  { %v675_v15 = vpop.xlane.xlu1 %674 }
 0x5c7   :  { %v686_v46 = vmul.f32 %v1990_v45, %v675_v15 }
 0x5c9   :  { %v688_v47 = vsub.f32 %v671_v31, %v686_v46 }
 0x5cb   :  { %v690_v48 = vmul.f32 %v688_v47, %v688_v47 }
 0x5cd   :  { %v692_v16 = vsel %vm226_vm2, %v690_v48, 0.0 }
 0x5ce   :  { %693 = vadd.xlane.f32.xlu0 %v692_v16 }
 0x5d2   :  { %v678_v49 = vpop.xlane.xlu2 %677 }
 0x5d3   :  { %v687_v50 = vmul.f32 %v1990_v45, %v678_v49 }
 0x5d5   :  { %v689_v51 = vsub.f32 %v672_v12, %v687_v50 }
 0x5d7   :  { %v691_v52 = vmul.f32 %v689_v51, %v689_v51 }
 0x5d9   :  { %v695_v53 = vsel %vm226_vm2, %v691_v52, 0.0 }
 0x5da   :  { %696 = vadd.xlane.f32.xlu1 %v695_v53 }
 0x641   :  { %v694_v57 = vpop.xlane.xlu0 %693 }
 0x642   :  { %v698_v58 = vmul.f32 %v694_v57, %v1990_v45 }
 0x644   :  { %v700_v59 = vadd.f32 1e-05, %v698_v58 }
 0x646   :  { %1453 = vrsqrt.f32 %v700_v59  ;;  %vm708_vm7 = vweird.f32 %v700_v59 }
 0x64c   :  { %v1454_v62 = vpop.eup %1453 }
 0x64d   :  { %v703_v0 = vmul.f32 %v1454_v62, %v700_v59  ;;  %v697_v1 = vpop.xlane.xlu1 %696  ;;  %vm709_vm6 = vweird.f32 %v1454_v62 }
 0x64e   :  { %v699_v2 = vmul.f32 %v697_v1, %v1990_v45  ;;  %vm710_vm8 = vmor %vm708_vm7, %vm709_vm6  ;;  %vm984_vm6 = vcmask 1041408  }
 0x64f   :  { %v704_v4 = vmul.f32 %v1454_v62, %v703_v0 }
 0x650   :  { %v701_v5 = vadd.f32 1e-05, %v699_v2 }
 0x651   :  { %v705_v7 = vmul.f32 0.5, %v704_v4 }
 0x652   :  { %1455 = vrsqrt.f32 %v701_v5  ;;  %vm718_vm10 = vweird.f32 %v701_v5 }
 0x653   :  { %v706_v8 = vsub.f32 1.5, %v705_v7 }
 0x655   :  { %v707_v9 = vmul.f32 %v1454_v62, %v706_v8 }
 0x657   :  { %v711_v11 = vsel %vm710_vm8, %v1454_v62, %v707_v9 }
 0x658   :  { %v1456_v14 = vpop.eup %1455  ;;  %v722_v17 = vmul.f32 %v711_v11, %v688_v47 }
 0x659   :  { %v713_v20 = vmul.f32 %v1456_v14, %v701_v5  ;;  %vm719_vm9 = vweird.f32 %v1456_v14 }
 0x65a   :  { %v725_v21 = vmul.f32 %v724_v10, %v722_v17  ;;  %vm720_vm11 = vmor %vm718_vm10, %vm719_vm9  ;;  %v854_v17 = vperm.slane %v1887_v18, 7  ;;  %vm945_vm9 = vcmask 9216  }
 0x65b   :  { %v714_v22 = vmul.f32 %v1456_v14, %v713_v20 }
 0x65c   :  { %v728_v23 = vadd.f32 %v727_v19, %v725_v21 }
 0x65d   :  { %v715_v24 = vmul.f32 0.5, %v714_v22 }
 0x65e   :  { %1347 = vmatmul.msk.f32.vlgmr.msrb.gmra.mxu3 %vm226_vm2, %v728_v23 }
 0x65f   :  { %v716_v26 = vsub.f32 1.5, %v715_v24 }
 0x661   :  { %v717_v27 = vmul.f32 %v1456_v14, %v716_v26 }
 0x663   :  { %v721_v28 = vsel %vm720_vm11, %v1456_v14, %v717_v27  ;;  %vm980_vm11 = vcmask 15360  }
 0x664   :  { %v723_v29 = vmul.f32 %v721_v28, %v689_v51 }
 0x666   :  { %v726_v30 = vmul.f32 %v724_v10, %v723_v29  ;;  %v851_v10 = vperm.slane %v1887_v18, 6  ;;  %v857_v29 = vld [vmem:[#allocation4] sm:$0x3]  ;;  %v1704_v18 = vmov 65  }
 0x667   :  { %1415 = vset.pattern.permute.xlu1 %v1704_v18  ;;  %1418 = vset.pattern.permute.xlu0 %v1704_v18 }
 0x668   :  { %v729_v31 = vadd.f32 %v727_v19, %v726_v30  ;;  %v882_v30 = vld [vmem:[#allocation7] sm:$0xff] }
 0x669   :  { %905 = vmatpush.msrb.mxu2 %v882_v30 }
 0x66a   :  { %1348 = vmatmul.msk.f32.gmra.mxu3 %vm226_vm2, %v729_v31 }
 0x6e1   :  { %v758_v36 = vpop.f32.mrf.mxu3 }
 0x6e2   :  { %v759_v37 = vadd.f32 %v758_v36, %v734_v35 }
 0x6e4   :  { %v764_v38 = vmax.f32 %v759_v37, 0.0 }
 0x6e6   :  { %1349 = vmatmul.msk.f32.vlgmr.msrb.gmra.mxu0 %vm775_vm12, %v764_v38  ;;  %v2062_v38 = vld [vmem:[%s2116_s3] sm:$0x3] }
 0x6e7   :  { %vm943_vm8 = vcmp.gt.f32.partialorder %v2062_v38, 0.0  ;;  %v1194_v38 = vld [vmem:[%s2125_s12 + $0x8] sm:$0xff] }
 0x6ed   :  { %v761_v12 = vpop.f32.mrf.mxu3 }
 0x6ee   :  { %v762_v40 = vadd.f32 %v761_v12, %v734_v35 }
 0x6f0   :  { %v765_v41 = vmax.f32 %v762_v40, 0.0 }
 0x6f2   :  { %1350 = vmatmul.msk.f32.gmra.mxu0 %vm775_vm12, %v765_v41 }
 0x763   :  { %v799_v39 = vpop.f32.mrf.mxu0 }
 0x764   :  { %v800_v15 = vadd.f32 %v799_v39, %v774_v42 }
 0x766   :  { %v805_v47 = vadd.f32 %v800_v15, %v728_v23 }
 0x768   :  { %v807_v48 = vsel %vm226_vm2, %v805_v47, 0.0 }
 0x76f   :  { %v802_v13 = vpop.f32.mrf.mxu0 }
 0x770   :  { %v803_v43 = vadd.f32 %v802_v13, %v774_v42 }
 0x772   :  { %v806_v44 = vadd.f32 %v803_v43, %v729_v31  ;;  %v1705_v31 = vmov 64  }
 0x773   :  { %1414 = vset.pattern.permute.xlu2 %v1705_v31 }
 0x774   :  { %v810_v46 = vsel %vm226_vm2, %v806_v44, 0.0 }
 0x775   :  { %811 = vadd.xlane.f32.xlu1 %v810_v46 }
 0x77d   :  { %808 = vadd.xlane.f32.xlu1 %v807_v48 }
 0x7e8   :  { %v812_v16 = vpop.xlane.xlu1 %811 }
 0x7e9   :  { %v814_v49 = vmul.f32 %v812_v16, %v1990_v45 }
 0x7eb   :  { %v816_v50 = vsub.f32 %v806_v44, %v814_v49 }
 0x7ed   :  { %v818_v51 = vmul.f32 %v816_v50, %v816_v50 }
 0x7ef   :  { %v822_v52 = vsel %vm226_vm2, %v818_v51, 0.0 }
 0x7f0   :  { %823 = vadd.xlane.f32.xlu1 %v822_v52  ;;  %v809_v53 = vpop.xlane.xlu1 %808 }
 0x7f1   :  { %v813_v54 = vmul.f32 %v809_v53, %v1990_v45 }
 0x7f3   :  { %v815_v55 = vsub.f32 %v805_v47, %v813_v54 }
 0x7f5   :  { %v817_v25 = vmul.f32 %v815_v55, %v815_v55 }
 0x7f7   :  { %v819_v56 = vsel %vm226_vm2, %v817_v25, 0.0 }
 0x7f8   :  { %820 = vadd.xlane.f32.xlu1 %v819_v56 }
 0x863   :  { %v824_v57 = vpop.xlane.xlu1 %823 }
 0x864   :  { %v826_v58 = vmul.f32 %v824_v57, %v1990_v45 }
 0x866   :  { %v828_v59 = vadd.f32 1e-05, %v826_v58 }
 0x868   :  { %1457 = vrsqrt.f32 %v828_v59  ;;  %vm845_vm14 = vweird.f32 %v828_v59 }
 0x86b   :  { %v821_v62 = vpop.xlane.xlu1 %820 }
 0x86c   :  { %v825_v0 = vmul.f32 %v821_v62, %v1990_v45 }
 0x86e   :  { %v1458_v1 = vpop.eup %1457  ;;  %v827_v2 = vadd.f32 1e-05, %v825_v0  ;;  %v1042_v0 = vld [vmem:[#allocation7 + $0x38] sm:$0xff] }
 0x86f   :  { %v840_v3 = vmul.f32 %v1458_v1, %v828_v59  ;;  %vm846_vm13 = vweird.f32 %v1458_v1 }
 0x870   :  { %1459 = vrsqrt.f32 %v827_v2  ;;  %vm847_vm15 = vmor %vm845_vm14, %vm846_vm13  ;;  %vm835_vm1 = vweird.f32 %v827_v2 }
 0x871   :  { %v841_v4 = vmul.f32 %v1458_v1, %v840_v3  ;;  %v1039_v3 = vld [vmem:[#allocation7 + $0x20] sm:$0xff] }
 0x873   :  { %v842_v5 = vmul.f32 0.5, %v841_v4 }
 0x875   :  { %v843_v6 = vsub.f32 1.5, %v842_v5 }
 0x876   :  { %v1460_v7 = vpop.eup %1459 }
 0x877   :  { %v844_v8 = vmul.f32 %v1458_v1, %v843_v6  ;;  %v830_v9 = vmul.f32 %v1460_v7, %v827_v2  ;;  %vm836_vm0 = vweird.f32 %v1460_v7  ;;  %v1040_v2 = vld [vmem:[#allocation7 + $0x28] sm:$0xff] }
 0x878   :  { %vm837_vm5 = vmor %vm835_vm1, %vm836_vm0 }
 0x879   :  { %v848_v11 = vsel %vm847_vm15, %v1458_v1, %v844_v8  ;;  %v831_v14 = vmul.f32 %v1460_v7, %v830_v9  ;;  %v1041_v1 = vld [vmem:[#allocation7 + $0x30] sm:$0xff] }
 0x87a   :  { %v850_v45 = vmul.f32 %v848_v11, %v816_v50 }
 0x87b   :  { %v832_v19 = vmul.f32 0.5, %v831_v14  ;;  %v1044_v14 = vld [vmem:[#allocation9 + $0x2] sm:$0x3] }
 0x87c   :  { %v853_v20 = vmul.f32 %v851_v10, %v850_v45 }
 0x87d   :  { %v833_v21 = vsub.f32 1.5, %v832_v19 }
 0x87e   :  { %v856_v22 = vadd.f32 %v854_v17, %v853_v20 }
 0x87f   :  { %v834_v23 = vmul.f32 %v1460_v7, %v833_v21 }
 0x880   :  { %875 = vmatpush.msrb.mxu1 %v856_v22 }
 0x881   :  { %v838_v24 = vsel %vm837_vm5, %v1460_v7, %v834_v23 }
 0x882   :  { %v849_v26 = vmul.f32 %v838_v24, %v815_v55 }
 0x884   :  { %v852_v27 = vmul.f32 %v851_v10, %v849_v26 }
 0x886   :  { %v855_v28 = vadd.f32 %v854_v17, %v852_v27 }
 0x888   :  { %876 = vmatpush.msrb.mxu1 %v855_v28 }
 0x889   :  { %1351 = vmatmul.msk.f32.vlgmr.msrb.gmra.mxu1 %vm322_vm4, %v857_v29 }
 0x906   :  { %v878_v32 = vpop.f32.mrf.mxu1 }
 0x907   :  { %1352 = vmatmul.msk.f32.vlgmr.msrb.gmra.mxu2 %vm226_vm2, %v878_v32  ;;  %1353 = vmatpush.xpose.msk.msra.mxu3 %vm226_vm2, %v878_v32 }
 0x90a   :  { %1354 = vmatmul.msk.f32.vlgmr.msra.gmra.mxu3 %vm226_vm2, %v886_v33 }
 0x90b   :  { %1060 = vmatpush.msrb.mxu3 %v1042_v0 }
 0x90d   :  { %1061 = vmatpush.msrb.mxu3 %v1041_v1 }
 0x90f   :  { %1062 = vmatpush.msrb.mxu3 %v1040_v2 }
 0x911   :  { %1063 = vmatpush.msrb.mxu3 %v1039_v3 }
 0x913   :  { %1213 = vmatpush.msra.mxu3 %v1194_v38 }
 0x98a   :  { %v907_v34 = vpop.f32.mrf.mxu2 }
 0x98b   :  { %958 = vperm.xlu1 %1415, %v907_v34   ;;  %935 = vperm.xlu2 %1414, %v907_v34  }
 0x98c   :  { %1357 = vmatpush.msk.msra.mxu2 %vm984_vm6, %v907_v34 }
 0x98d   :  { %v930_v35 = vpop.f32.mrf.mxu3 }
 0x98e   :  { %v938_v36 = vperm.slane %v930_v35, 0  ;;  %v961_v13 = vperm.slane %v930_v35, 1 }
 0x993   :  { %1416 = vset.pattern.permute.xlu1 %v1705_v31 }
 0x9e5   :  { %v936_v37 = vpop.permute.xlu2 %935 }
 0x9e6   :  { %v939_v12 = vadd.f32 %v938_v36, %v936_v37 }
 0x9e8   :  { %v941_v40 = vmul.f32 0.2, %v939_v12  ;;  %vm940_vm7 = vcmp.gt.f32.partialorder %v939_v12, 0.0 }
 0x9ea   :  { %v942_v41 = vsel %vm940_vm7, %v939_v12, %v941_v40 }
 0x9eb   :  { %v944_v39 = vsel %vm943_vm8, %v942_v41, -9e+15 }
 0x9ec   :  { %v946_v42 = vsel %vm945_vm9, %v944_v39, -inf }
 0x9ed   :  { %947 = vmax.xlane.f32.xlu0 %v946_v42 }
 0x9fd   :  { %v959_v43 = vpop.permute.xlu1 %958 }
 0x9fe   :  { %v962_v44 = vadd.f32 %v961_v13, %v959_v43  ;;  %v1193_v13 = vld [vmem:[%s2125_s12] sm:$0xff] }
 0x9ff   :  { %v1192_v43 = vld [vmem:[%s2115_s2] sm:$0x3]  ;;  %1214 = vmatpush.msra.mxu3 %v1193_v13 }
 0xa00   :  { %v964_v15 = vmul.f32 0.2, %v962_v44  ;;  %vm963_vm10 = vcmp.gt.f32.partialorder %v962_v44, 0.0 }
 0xa02   :  { %v965_v46 = vsel %vm963_vm10, %v962_v44, %v964_v15 }
 0xa03   :  { %v966_v47 = vsel %vm943_vm8, %v965_v46, -9e+15 }
 0xa04   :  { %v967_v48 = vsel %vm945_vm9, %v966_v47, -inf }
 0xa05   :  { %968 = vmax.xlane.f32.xlu0 %v967_v48 }
 0xa60   :  { %v948_v16 = vpop.xlane.xlu0 %947 }
 0xa61   :  { %v949_v49 = vsub.f32 %v944_v39, %v948_v16 }
 0xa63   :  { %v950_v50 = vmul.f32 1.442695, %v949_v49 }
 0xa65   :  { %1461 = vpow2.f32 %v950_v50  ;;  %v1223_v50 = vld [vmem:[#allocation10 + $0x18] sm:$0xff] }
 0xa6b   :  { %v1462_v51 = vpop.eup %1461 }
 0xa6c   :  { %v952_v52 = vsel %vm945_vm9, %v1462_v51, 0.0 }
 0xa6d   :  { %953 = vadd.xlane.f32.xlu0 %v952_v52 }
 0xa78   :  { %v969_v53 = vpop.xlane.xlu0 %968 }
 0xa79   :  { %v970_v54 = vsub.f32 %v966_v47, %v969_v53  ;;  %v1222_v53 = vld [vmem:[#allocation10 + $0x10] sm:$0xff] }
 0xa7b   :  { %v971_v55 = vmul.f32 1.442695, %v970_v54 }
 0xa7d   :  { %1463 = vpow2.f32 %v971_v55 }
 0xa81   :  { %978 = vrot.lane.b32.xlu0 %v907_v34, %s1695_s30 }
 0xa83   :  { %v1464_v25 = vpop.eup %1463 }
 0xa84   :  { %v973_v56 = vsel %vm945_vm9, %v1464_v25, 0.0 }
 0xa85   :  { %974 = vadd.xlane.f32.xlu2 %v973_v56 }
 0xae0   :  { %v954_v57 = vpop.xlane.xlu0 %953 }
 0xae1   :  { %1465 = vrcp.f32 %v954_v57  ;;  %v1224_v57 = vld [vmem:[%s2127_s14] sm:$0xff] }
 0xae7   :  { %v1466_v58 = vpop.eup %1465 }
 0xae8   :  { %v956_v59 = vmul.f32 %v1466_v58, %v1462_v51  ;;  %v178_v51 = vld [vmem:[#allocation13 + $0x8] sm:$0xff]  ;;  %v1220_v58 = vld [vmem:[#allocation10] sm:$0xff] }
 0xae9   :  { %v1195_v52 = vperm.slane %v178_v51, 0 }
 0xaea   :  { %1358 = vmatmul.msk.f32.vlgmr.msra.gmra.mxu2 %vm980_vm11, %v956_v59  ;;  %v1281_v59 = vld [vmem:[#allocation12 + $0x38] sm:$0xff] }
 0xaf3   :  { %v979_v60 = vpop.permute.xlu0 %978 }
 0xaf4   :  { %1355 = vmatpush.msk.msra.mxu1 %vm984_vm6, %v979_v60  ;;  %v1280_v60 = vld [vmem:[#allocation12 + $0x30] sm:$0xff] }
 0xaf8   :  { %v975_v61 = vpop.xlane.xlu2 %974 }
 0xaf9   :  { %1467 = vrcp.f32 %v975_v61  ;;  %v1279_v61 = vld [vmem:[#allocation12 + $0x28] sm:$0xff] }
 0xaff   :  { %v1468_v62 = vpop.eup %1467 }
 0xb00   :  { %v977_v63 = vmul.f32 %v1468_v62, %v1464_v25  ;;  %v1221_v25 = vld [vmem:[#allocation10 + $0x8] sm:$0xff]  ;;  %v1278_v62 = vld [vmem:[#allocation12 + $0x20] sm:$0xff] }
 0xb02   :  { %1356 = vmatmul.msk.f32.vlgmr.msra.gmra.mxu1 %vm980_vm11, %v977_v63 }
 0xb6d   :  { %v1029_v4 = vpop.f32.mrf.mxu2 }
 0xb7f   :  { %v1004_v5 = vpop.f32.mrf.mxu1 }
 0xb80   :  { %v1030_v6 = vadd.f32 %v1029_v4, %v1004_v5 }
 0xb82   :  { %v1032_v7 = vmul.f32 0.5, %v1030_v6 }
 0xb84   :  { %v1034_v8 = vmul.f32 1.442695, %v1032_v7  ;;  %vm1033_vm13 = vcmp.gt.f32.partialorder %v1032_v7, 0.0 }
 0xb86   :  { %1469 = vpow2.f32 %v1034_v8  ;;  %v1276_v8 = vld [vmem:[#allocation12 + $0x10] sm:$0xff] }
 0xb8c   :  { %v1470_v9 = vpop.eup %1469 }
 0xb8d   :  { %v1359_v10 = vadd.f32 -1.0, %v1470_v9  ;;  %v1275_v9 = vld [vmem:[#allocation12 + $0x8] sm:$0xff] }
 0xb8f   :  { %v1037_v11 = vsel %vm1033_vm13, %v1032_v7, %v1359_v10  ;;  %v1277_v7 = vld [vmem:[#allocation12 + $0x18] sm:$0xff]  ;;  %v1274_v10 = vld [vmem:[#allocation12] sm:$0xff] }
 0xb90   :  { %1360 = vmatmul.msk.f32.vlgmr.msrb.gmra.mxu3 %vm226_vm2, %v1037_v11  ;;  %1361 = vmatpush.xpose.msk.msra.mxu0 %vm226_vm2, %v1037_v11 }
 0xb93   :  { %1362 = vmatmul.msk.f32.vlgmr.msra.gmra.mxu0 %vm226_vm2, %v1044_v14  ;;  %v1271_v14 = vperm.slane %v178_v51, 1 }
 0xb94   :  { %1243 = vmatpush.msrb.mxu0 %v1224_v57 }
 0xb98   :  { %1368 = vmatmul.msk.f32.vlgmr.msra.gmra.mxu3 %vm322_vm4, %v1192_v43 }
 0xc10   :  { %v1088_v17 = vpop.f32.mrf.mxu0 }
 0xc11   :  { %v1096_v19 = vperm.slane %v1088_v17, 0  ;;  %v1117_v27 = vperm.slane %v1088_v17, 1 }
 0xc13   :  { %v1065_v45 = vpop.f32.mrf.mxu3 }
 0xc14   :  { %1093 = vperm.xlu1 %1416, %v1065_v45   ;;  %1365 = vmatpush.msk.msrb.mxu2 %vm984_vm6, %v1065_v45 }
 0xc16   :  { %1294 = vmatpush.msra.mxu2 %v1281_v59 }
 0xc18   :  { %1295 = vmatpush.msra.mxu2 %v1280_v60 }
 0xc1a   :  { %1296 = vmatpush.msra.mxu2 %v1279_v61 }
 0xc1b   :  { %v1216_v54 = vpop.f32.mrf.mxu3 }
 0xc1c   :  { %1417 = vset.pattern.permute.xlu1 %v1704_v18  ;;  %v1217_v55 = vadd.f32 %v1216_v54, %v1195_v52  ;;  %1297 = vmatpush.msra.mxu2 %v1278_v62 }
 0xc1d   :  { %1114 = vperm.xlu1 %1417, %v1065_v45  }
 0xc1e   :  { %v1219_v56 = vmax.f32 %v1217_v55, 0.0  ;;  %1298 = vmatpush.msra.mxu2 %v1277_v7 }
 0xc20   :  { %1369 = vmatmul.msk.f32.vlgmr.msrb.gmra.mxu0 %vm290_vm3, %v1219_v56  ;;  %1299 = vmatpush.msra.mxu2 %v1276_v8 }
 0xc22   :  { %1300 = vmatpush.msra.mxu2 %v1275_v9 }
 0xc24   :  { %1301 = vmatpush.msra.mxu2 %v1274_v10 }
 0xc86   :  { %v1094_v20 = vpop.permute.xlu1 %1093 }
 0xc87   :  { %v1097_v21 = vadd.f32 %v1096_v19, %v1094_v20 }
 0xc89   :  { %v1099_v22 = vmul.f32 0.2, %v1097_v21  ;;  %vm1098_vm14 = vcmp.gt.f32.partialorder %v1097_v21, 0.0 }
 0xc8b   :  { %v1100_v23 = vsel %vm1098_vm14, %v1097_v21, %v1099_v22  ;;  %v1282_v21 = vperm.slane %v178_v51, 2 }
 0xc8c   :  { %v1101_v24 = vsel %vm943_vm8, %v1100_v23, -9e+15 }
 0xc8d   :  { %v1102_v26 = vsel %vm945_vm9, %v1101_v24, -inf }
 0xc8e   :  { %1103 = vmax.xlane.f32.xlu1 %v1102_v26 }
 0xc8f   :  { %v1115_v28 = vpop.permute.xlu1 %1114 }
 0xc90   :  { %v1118_v29 = vadd.f32 %v1117_v27, %v1115_v28 }
 0xc92   :  { %v1120_v30 = vmul.f32 0.2, %v1118_v29  ;;  %vm1119_vm15 = vcmp.gt.f32.partialorder %v1118_v29, 0.0 }
 0xc94   :  { %v1121_v18 = vsel %vm1119_vm15, %v1118_v29, %v1120_v30 }
 0xc95   :  { %v1122_v31 = vsel %vm943_vm8, %v1121_v18, -9e+15 }
 0xc96   :  { %v1123_v32 = vsel %vm945_vm9, %v1122_v31, -inf }
 0xc97   :  { %1124 = vmax.xlane.f32.xlu0 %v1123_v32 }
 0xc9d   :  { %v1245_v11 = vpop.f32.mrf.mxu0 }
 0xd01   :  { %v1104_v33 = vpop.xlane.xlu1 %1103 }
 0xd02   :  { %v1105_v34 = vsub.f32 %v1101_v24, %v1104_v33 }
 0xd04   :  { %v1106_v35 = vmul.f32 1.442695, %v1105_v34 }
 0xd06   :  { %1471 = vpow2.f32 %v1106_v35 }
 0xd0a   :  { %v1125_v36 = vpop.xlane.xlu0 %1124 }
 0xd0b   :  { %v1126_v37 = vsub.f32 %v1122_v31, %v1125_v36 }
 0xd0c   :  { %v1472_v12 = vpop.eup %1471 }
 0xd0d   :  { %v1127_v40 = vmul.f32 1.442695, %v1126_v37  ;;  %v1108_v41 = vsel %vm945_vm9, %v1472_v12, 0.0 }
 0xd0e   :  { %1109 = vadd.xlane.f32.xlu2 %v1108_v41 }
 0xd0f   :  { %1473 = vpow2.f32 %v1127_v40 }
 0xd15   :  { %v1474_v39 = vpop.eup %1473 }
 0xd16   :  { %v1129_v42 = vsel %vm945_vm9, %v1474_v39, 0.0 }
 0xd17   :  { %1130 = vadd.xlane.f32.xlu2 %v1129_v42 }
 0xd2f   :  { %1134 = vrot.lane.b32.xlu2 %v1065_v45, %s1695_s30 }
 0xd81   :  { %v1110_v44 = vpop.xlane.xlu2 %1109 }
 0xd82   :  { %1475 = vrcp.f32 %v1110_v44 }
 0xd88   :  { %v1476_v15 = vpop.eup %1475 }
 0xd89   :  { %v1112_v46 = vmul.f32 %v1476_v15, %v1472_v12 }
 0xd8a   :  { %v1131_v47 = vpop.xlane.xlu2 %1130 }
 0xd8b   :  { %1477 = vrcp.f32 %v1131_v47  ;;  %1366 = vmatmul.msk.f32.vlgmr.msrb.gmra.mxu2 %vm980_vm11, %v1112_v46 }
 0xd91   :  { %v1478_v48 = vpop.eup %1477 }
 0xd92   :  { %v1133_v16 = vmul.f32 %v1478_v48, %v1474_v39  ;;  %v1135_v49 = vpop.permute.xlu2 %1134 }
 0xd93   :  { %1363 = vmatpush.msk.msrb.mxu1 %vm984_vm6, %v1135_v49 }
 0xd94   :  { %1364 = vmatmul.msk.f32.vlgmr.msrb.gmra.mxu1 %vm980_vm11, %v1133_v16 }
 0xd95   :  { %1263 = vmatpush.msra.mxu1 %v1223_v50 }
 0xd97   :  { %1264 = vmatpush.msra.mxu1 %v1222_v53 }
 0xd99   :  { %1265 = vmatpush.msra.mxu1 %v1221_v25 }
 0xd9b   :  { %1266 = vmatpush.msra.mxu1 %v1220_v58 }
 0xe0e   :  { %v1183_v63 = vpop.f32.mrf.mxu2 }
 0xe11   :  { %v1158_v0 = vpop.f32.mrf.mxu1 }
 0xe12   :  { %v1184_v1 = vadd.f32 %v1183_v63, %v1158_v0 }
 0xe14   :  { %v1186_v2 = vmul.f32 0.5, %v1184_v1 }
 0xe16   :  { %v1188_v3 = vmul.f32 1.442695, %v1186_v2  ;;  %vm1187_vm4 = vcmp.gt.f32.partialorder %v1186_v2, 0.0 }
 0xe18   :  { %1479 = vpow2.f32 %v1188_v3 }
 0xe1e   :  { %v1480_v4 = vpop.eup %1479 }
 0xe1f   :  { %v1367_v5 = vadd.f32 -1.0, %v1480_v4 }
 0xe21   :  { %v1191_v6 = vsel %vm1187_vm4, %v1186_v2, %v1367_v5 }
 0xe22   :  { %1370 = vmatmul.msk.f32.vlgmr.msra.gmra.mxu1 %vm226_vm2, %v1191_v6 }
 0xe9f   :  { %v1268_v45 = vpop.f32.mrf.mxu1 }
 0xea0   :  { %v1269_v17 = vadd.f32 %v1268_v45, %v1245_v11 }
 0xea2   :  { %v1272_v19 = vadd.f32 %v1271_v14, %v1269_v17 }
 0xea4   :  { %v1273_v20 = vmax.f32 %v1272_v19, 0.0 }
 0xea6   :  { %1371 = vmatmul.msk.f32.vlgmr.msra.gmra.mxu2 %vm775_vm12, %v1273_v20 }
 0xf29   :  { %v1303_v22 = vpop.f32.mrf.mxu2 }
 0xf2a   :  { %v1304_v23 = vadd.f32 %v1303_v22, %v1282_v21 }
 0xf2c   :  { %1306 = vst [vmem:[%s2130_s17] sm:$0x3] %v1304_v23 }
 0xf2d   :  { %1311 = vsyncpa [#allocation3], 1 }
 0xf2e   :  { %1312 = vsyncpa [#allocation5], 1 }
 0xf2f   :  { %1313 = vsyncpa [#allocation8], 1 }
 0xf30   :  { %1314 = vsyncpa [#allocation11], 1 }
 0xf31   :  { %1315 = vsyncpa [#allocation14], 1 }

</bundles_post_ra>
